<compile_context>
chip_gen: v7x
topology: tpu7x:2x2x1
jax: 0.10.0
libtpu: 0.0.40
codegen_flags: <defaults>
</compile_context>

<pallas_src>
import functools

import jax
import jax.numpy as jnp
from jax import lax
from jax.experimental import pallas as pl
from jax.experimental.pallas import tpu as pltpu

# Tap order matches torch OIHW weight[:, :, dy, dx] with dy=oy+1, dx=ox+1.
_OFFSETS = tuple((oy, ox) for oy in (-1, 0, 1) for ox in (-1, 0, 1))
_DN = ("NCHW", "OIHW", "NCHW")


# ----------------------------------------------------------------------------
# Fused Pallas kernel: conv1(3x3,SN)+ReLU -> conv2(3x3,SN) + 1x1 SN shortcut
# ----------------------------------------------------------------------------
def dblock_kernel(x_ref, m_ref, w1_ref, b1_ref, w2_ref, wsc_ref, b_ref,
                  o_ref, h_ref, *, width, spatial):
    """One batch element per grid step.

    x_ref   : (Cin, S + 2W + 2)  bf16  flat spatial, zero-padded by W+1/side
    m_ref   : (2, 1, S)          bf16  column masks (ox=-1 / ox=+1 row wrap)
    w1_ref  : (9, Ch, Cin)       bf16  conv1 weights, tap-major
    b1_ref  : (Ch, 1)            f32
    w2_ref  : (9, Cout, Ch)      bf16  conv2 weights, tap-major
    wsc_ref : (Cout, Cin)        bf16  1x1 shortcut conv weights
    b_ref   : (Cout, 1)          f32   b2 + b_sc (pre-combined)
    o_ref   : (Cout, S)          f32   lane-dense output block
    h_ref   : (Ch, S + 2W + 2)   bf16  VMEM scratch for relu(conv1)
    """
    S = spatial
    pad = width + 1
    ch = w1_ref.shape[1]
    cout = w2_ref.shape[1]

    def conv3x3(src_ref, w_ref, n_out):
        # 3x3 pad-1 conv = 9 static lane-offset windows of the padded-flat
        # source, each a bf16 MXU GEMM accumulated into an f32 accumulator.
        acc = jnp.zeros((n_out, S), jnp.float32)
        for t, (oy, ox) in enumerate(_OFFSETS):
            d = oy * width + ox
            win = src_ref[:, pad + d:pad + d + S]          # (C, S) bf16
            if ox == -1:
                win = win * m_ref[0]                       # drop wrapped col x==0
            elif ox == 1:
                win = win * m_ref[1]                       # drop wrapped col x==W-1
            acc = acc + jnp.dot(w_ref[t], win,
                                preferred_element_type=jnp.float32)
        return acc

    # conv1 (3x3 SN) + bias + fused ReLU, kept entirely on-chip.
    h = conv3x3(x_ref, w1_ref, ch) + b1_ref[...]
    h_bf = jnp.maximum(h, 0.0).astype(jnp.bfloat16)

    # Stage relu(conv1) into a zero-padded VMEM scratch so conv2 reuses the
    # same halo-window scheme (zero padding == conv2's padding=1 semantics).
    h_ref[...] = jnp.zeros(h_ref.shape, jnp.bfloat16)
    h_ref[:, pad:pad + S] = h_bf

    # conv2 (3x3 SN) + 1x1 SN shortcut + residual add + combined bias.
    out = conv3x3(h_ref, w2_ref, cout)
    out = out + jnp.dot(wsc_ref[...], x_ref[:, pad:pad + S],
                        preferred_element_type=jnp.float32)
    out = out + b_ref[...]
    o_ref[...] = out.astype(o_ref.dtype)


# ----------------------------------------------------------------------------
# Wrapper-side helpers
# ----------------------------------------------------------------------------
def _edge_masks(H, W):
    """(2, 1, H*W) bf16 masks zeroing output columns whose +-1 x-neighbor
    wraps to the adjacent row in the flat spatial layout."""
    col = jnp.tile(jnp.arange(W, dtype=jnp.int32), H).reshape(1, 1, H * W)
    left = (col != 0).astype(jnp.bfloat16)       # ox == -1 taps
    right = (col != W - 1).astype(jnp.bfloat16)  # ox == +1 taps
    return jnp.concatenate([left, right], axis=0)


def spectral_norm_weight(w, u, eps=1e-12):
    """One power-iteration spectral normalization (SN.W_, num_svs=num_itrs=1).
    TODO(synk): training-time u/sv buffer updates are not persisted."""
    cout = w.shape[0]
    w_mat = w.reshape(cout, -1)
    v = u @ w_mat
    v = v / jnp.maximum(jnp.linalg.norm(v), eps)
    u_new = v @ w_mat.T
    u_new = u_new / jnp.maximum(jnp.linalg.norm(u_new), eps)
    sv = jnp.squeeze((v @ w_mat.T) @ u_new.T)
    return w / sv


@jax.jit
def dblock_forward(x, w1, b1, u1, w2, b2, u2, w_sc, b_sc, u_sc):
    """DBlock forward: conv2(relu(conv1(x))) + conv_sc(x), SN on all convs."""
    N, Cin, H, W = x.shape
    S = H * W
    Sp = S + 2 * (W + 1)
    Ch = w1.shape[0]
    Cout = w2.shape[0]

    w1n = spectral_norm_weight(w1, u1)
    w2n = spectral_norm_weight(w2, u2)
    wscn = spectral_norm_weight(w_sc, u_sc)

    # bf16 operands for native-rate MXU GEMMs (f32 accumulation in-kernel).
    w1_taps = jnp.transpose(w1n, (2, 3, 0, 1)).reshape(9, Ch, Cin)
    w1_taps = w1_taps.astype(jnp.bfloat16)
    w2_taps = jnp.transpose(w2n, (2, 3, 0, 1)).reshape(9, Cout, Ch)
    w2_taps = w2_taps.astype(jnp.bfloat16)
    wsc2d = wscn.reshape(Cout, Cin).astype(jnp.bfloat16)

    # Flat spatial axis with a (W+1)-wide zero halo on each side: the 9 conv
    # taps become static lane-offset windows (no 9x HBM im2col).
    xp = jnp.pad(x.reshape(N, Cin, S), ((0, 0), (0, 0), (W + 1, W + 1)))
    xp = xp.astype(jnp.bfloat16)

    masks = _edge_masks(H, W)
    b1c = b1.reshape(Ch, 1).astype(jnp.float32)
    bc = (b2 + b_sc).reshape(Cout, 1).astype(jnp.float32)

    flops = 2 * N * S * (9 * Ch * Cin + 9 * Cout * Ch + Cout * Cin)
    bytes_accessed = int(
        2 * (xp.size + masks.size + w1_taps.size + w2_taps.size + wsc2d.size)
        + 4 * (b1c.size + bc.size + N * Cout * S))

    kern = functools.partial(dblock_kernel, width=W, spatial=S)
    out = pl.pallas_call(
        kern,
        out_shape=jax.ShapeDtypeStruct((N, Cout, S), jnp.float32),
        grid=(N,),
        in_specs=[
            pl.BlockSpec((None, Cin, Sp), lambda n: (n, 0, 0)),
            pl.BlockSpec((2, 1, S), lambda n: (0, 0, 0)),
            pl.BlockSpec((9, Ch, Cin), lambda n: (0, 0, 0)),
            pl.BlockSpec((Ch, 1), lambda n: (0, 0)),
            pl.BlockSpec((9, Cout, Ch), lambda n: (0, 0, 0)),
            pl.BlockSpec((Cout, Cin), lambda n: (0, 0)),
            pl.BlockSpec((Cout, 1), lambda n: (0, 0)),
        ],
        out_specs=pl.BlockSpec((None, Cout, S), lambda n: (n, 0, 0)),
        scratch_shapes=[pltpu.VMEM((Ch, Sp), jnp.bfloat16)],
        compiler_params=pltpu.CompilerParams(
            dimension_semantics=("parallel",),
            vmem_limit_bytes=32 * 1024 * 1024),
        cost_estimate=pl.CostEstimate(flops=flops, transcendentals=0,
                                      bytes_accessed=bytes_accessed),
    )(xp, masks, w1_taps, b1c, w2_taps, wsc2d, bc)
    return out.reshape(N, Cout, H, W)


# ----------------------------------------------------------------------------
# Pure-JAX references
# ----------------------------------------------------------------------------
def _conv(x, w, padding, precision=None):
    return lax.conv_general_dilated(
        x, w, (1, 1), padding, dimension_numbers=_DN,
        precision=precision, preferred_element_type=jnp.float32)


def dblock_reference_f32(x, w1, b1, u1, w2, b2, u2, w_sc, b_sc, u_sc):
    """Exact-precision reference (mirrors the PyTorch forward)."""
    w1n = spectral_norm_weight(w1, u1)
    w2n = spectral_norm_weight(w2, u2)
    wscn = spectral_norm_weight(w_sc, u_sc)
    hi = lax.Precision.HIGHEST
    h = _conv(x, w1n, ((1, 1), (1, 1)), hi) + b1[None, :, None, None]
    h = jnp.maximum(h, 0.0)
    h = _conv(h, w2n, ((1, 1), (1, 1)), hi) + b2[None, :, None, None]
    sc = _conv(x, wscn, ((0, 0), (0, 0)), hi) + b_sc[None, :, None, None]
    return h + sc


def dblock_reference_bf16(x, w1, b1, u1, w2, b2, u2, w_sc, b_sc, u_sc):
    """Reference matching the kernel numerics: bf16 operands, f32 accumulate."""
    w1n = spectral_norm_weight(w1, u1).astype(jnp.bfloat16)
    w2n = spectral_norm_weight(w2, u2).astype(jnp.bfloat16)
    wscn = spectral_norm_weight(w_sc, u_sc).astype(jnp.bfloat16)
    xb = x.astype(jnp.bfloat16)
    h = _conv(xb, w1n, ((1, 1), (1, 1))) + b1[None, :, None, None]
    h = jnp.maximum(h, 0.0).astype(jnp.bfloat16)
    h = _conv(h, w2n, ((1, 1), (1, 1))) + b2[None, :, None, None]
    sc = _conv(xb, wscn, ((0, 0), (0, 0))) + b_sc[None, :, None, None]
    return h + sc


if __name__ == "__main__":
    # NCHW input, in=4 -> out=8 channels (learnable_sc active), 16x16 spatial
    # (H*W = 256 lanes, lane-dense output blocks).
    B, Cin, Cout, H, W = 2, 4, 8, 16, 16
    Ch = Cout  # wide=True -> hidden_channels == out_channels

    key = jax.random.PRNGKey(0)
    ks = jax.random.split(key, 10)
    x = jax.random.normal(ks[0], (B, Cin, H, W), dtype=jnp.float32)

    w1 = 0.1 * jax.random.normal(ks[1], (Ch, Cin, 3, 3), dtype=jnp.float32)
    b1 = 0.1 * jax.random.normal(ks[2], (Ch,), dtype=jnp.float32)
    w2 = 0.1 * jax.random.normal(ks[3], (Cout, Ch, 3, 3), dtype=jnp.float32)
    b2 = 0.1 * jax.random.normal(ks[4], (Cout,), dtype=jnp.float32)
    w_sc = 0.1 * jax.random.normal(ks[5], (Cout, Cin, 1, 1), dtype=jnp.float32)
    b_sc = 0.1 * jax.random.normal(ks[6], (Cout,), dtype=jnp.float32)
    # Spectral-norm power-iteration buffers (randn, as in SN.__init__).
    u1 = jax.random.normal(ks[7], (1, Ch), dtype=jnp.float32)
    u2 = jax.random.normal(ks[8], (1, Cout), dtype=jnp.float32)
    u_sc = jax.random.normal(ks[9], (1, Cout), dtype=jnp.float32)

    out = dblock_forward(x, w1, b1, u1, w2, b2, u2, w_sc, b_sc, u_sc)
    out = jax.block_until_ready(out)

    ref_bf16 = dblock_reference_bf16(x, w1, b1, u1, w2, b2, u2,
                                     w_sc, b_sc, u_sc)
    ref_f32 = dblock_reference_f32(x, w1, b1, u1, w2, b2, u2,
                                   w_sc, b_sc, u_sc)

    assert out.shape == (B, Cout, H, W)
    assert jnp.allclose(out, ref_bf16, atol=2e-3, rtol=2e-3), \
        "mismatch vs bf16-matched reference"
    assert jnp.allclose(out, ref_f32, atol=6e-2, rtol=6e-2), \
        "mismatch vs f32 reference"

    print("KERNEL_OK")
</pallas_src>

<mosaic_0001>
module attributes {stable_mosaic.version = 11 : i64} {
  func.func @dblock_kernel(%arg0: i32, %arg1: memref<1x4x290xbf16, #tpu.memory_space<vmem>>, %arg2: memref<2x1x256xbf16, #tpu.memory_space<vmem>>, %arg3: memref<9x8x4xbf16, #tpu.memory_space<vmem>>, %arg4: memref<8x1xf32, #tpu.memory_space<vmem>>, %arg5: memref<9x8x8xbf16, #tpu.memory_space<vmem>>, %arg6: memref<8x4xbf16, #tpu.memory_space<vmem>>, %arg7: memref<8x1xf32, #tpu.memory_space<vmem>>, %arg8: memref<1x8x256xf32, #tpu.memory_space<vmem>>, %arg9: memref<8x290xbf16, #tpu.memory_space<vmem>>) attributes {dimension_semantics = [#tpu.dimension_semantics<parallel>], iteration_bounds = array<i64: 2>, scalar_prefetch = 0 : i64, scratch_operands = 1 : i64, tpu.core_type = #tpu.core_type<tc>, window_params = [{transform_indices = @transform_0, window_bounds = array<i64: 1, 4, 290>}, {pipeline_mode = #tpu.pipeline_mode<synchronous>, transform_indices = @transform_1, window_bounds = array<i64: 2, 1, 256>}, {pipeline_mode = #tpu.pipeline_mode<synchronous>, transform_indices = @transform_2, window_bounds = array<i64: 9, 8, 4>}, {pipeline_mode = #tpu.pipeline_mode<synchronous>, transform_indices = @transform_3, window_bounds = array<i64: 8, 1>}, {pipeline_mode = #tpu.pipeline_mode<synchronous>, transform_indices = @transform_4, window_bounds = array<i64: 9, 8, 8>}, {pipeline_mode = #tpu.pipeline_mode<synchronous>, transform_indices = @transform_5, window_bounds = array<i64: 8, 4>}, {pipeline_mode = #tpu.pipeline_mode<synchronous>, transform_indices = @transform_6, window_bounds = array<i64: 8, 1>}, {transform_indices = @transform_7, window_bounds = array<i64: 1, 8, 256>}]} {
    %cst = arith.constant 0.000000e+00 : f32
    %0 = vector.broadcast %cst : f32 to vector<8x256xf32>
    %c0 = arith.constant 0 : index
    %c0_0 = arith.constant 0 : index
    %c0_1 = arith.constant 0 : index
    %1 = vector.load %arg1[%c0, %c0_0, %c0_1] : memref<1x4x290xbf16, #tpu.memory_space<vmem>>, vector<1x4x256xbf16>
    %2 = vector.shape_cast %1 : vector<1x4x256xbf16> to vector<4x256xbf16>
    %c0_2 = arith.constant 0 : index
    %c0_3 = arith.constant 0 : index
    %c0_4 = arith.constant 0 : index
    %3 = vector.load %arg2[%c0_2, %c0_3, %c0_4] : memref<2x1x256xbf16, #tpu.memory_space<vmem>>, vector<1x1x256xbf16>
    %4 = vector.shape_cast %3 : vector<1x1x256xbf16> to vector<1x256xbf16>
    %5 = vector.broadcast %4 : vector<1x256xbf16> to vector<4x256xbf16>
    %6 = arith.mulf %2, %5 : vector<4x256xbf16>
    %c0_5 = arith.constant 0 : index
    %c0_6 = arith.constant 0 : index
    %c0_7 = arith.constant 0 : index
    %7 = vector.load %arg3[%c0_5, %c0_6, %c0_7] : memref<9x8x4xbf16, #tpu.memory_space<vmem>>, vector<1x8x4xbf16>
    %8 = vector.shape_cast %7 : vector<1x8x4xbf16> to vector<8x4xbf16>
    %cst_8 = arith.constant dense<0.000000e+00> : vector<8x256xf32>
    %9 = tpu.matmul %8, %6, %cst_8 {dimension_numbers = #tpu.dot_dimension_numbers<[1], [0], [0], [1], [0, 0, 1, 1], [], []>} : vector<8x4xbf16>, vector<4x256xbf16>, vector<8x256xf32> -> vector<8x256xf32>
    %10 = arith.addf %0, %9 : vector<8x256xf32>
    %c0_9 = arith.constant 0 : index
    %c0_10 = arith.constant 0 : index
    %c1 = arith.constant 1 : index
    %11 = vector.load %arg1[%c0_9, %c0_10, %c1] : memref<1x4x290xbf16, #tpu.memory_space<vmem>>, vector<1x4x256xbf16>
    %12 = vector.shape_cast %11 : vector<1x4x256xbf16> to vector<4x256xbf16>
    %c1_11 = arith.constant 1 : index
    %c0_12 = arith.constant 0 : index
    %c0_13 = arith.constant 0 : index
    %13 = vector.load %arg3[%c1_11, %c0_12, %c0_13] : memref<9x8x4xbf16, #tpu.memory_space<vmem>>, vector<1x8x4xbf16>
    %14 = vector.shape_cast %13 : vector<1x8x4xbf16> to vector<8x4xbf16>
    %cst_14 = arith.constant dense<0.000000e+00> : vector<8x256xf32>
    %15 = tpu.matmul %14, %12, %cst_14 {dimension_numbers = #tpu.dot_dimension_numbers<[1], [0], [0], [1], [0, 0, 1, 1], [], []>} : vector<8x4xbf16>, vector<4x256xbf16>, vector<8x256xf32> -> vector<8x256xf32>
    %16 = arith.addf %10, %15 : vector<8x256xf32>
    %c0_15 = arith.constant 0 : index
    %c0_16 = arith.constant 0 : index
    %c2 = arith.constant 2 : index
    %17 = vector.load %arg1[%c0_15, %c0_16, %c2] : memref<1x4x290xbf16, #tpu.memory_space<vmem>>, vector<1x4x256xbf16>
    %18 = vector.shape_cast %17 : vector<1x4x256xbf16> to vector<4x256xbf16>
    %c1_17 = arith.constant 1 : index
    %c0_18 = arith.constant 0 : index
    %c0_19 = arith.constant 0 : index
    %19 = vector.load %arg2[%c1_17, %c0_18, %c0_19] : memref<2x1x256xbf16, #tpu.memory_space<vmem>>, vector<1x1x256xbf16>
    %20 = vector.shape_cast %19 : vector<1x1x256xbf16> to vector<1x256xbf16>
    %21 = vector.broadcast %20 : vector<1x256xbf16> to vector<4x256xbf16>
    %22 = arith.mulf %18, %21 : vector<4x256xbf16>
    %c2_20 = arith.constant 2 : index
    %c0_21 = arith.constant 0 : index
    %c0_22 = arith.constant 0 : index
    %23 = vector.load %arg3[%c2_20, %c0_21, %c0_22] : memref<9x8x4xbf16, #tpu.memory_space<vmem>>, vector<1x8x4xbf16>
    %24 = vector.shape_cast %23 : vector<1x8x4xbf16> to vector<8x4xbf16>
    %cst_23 = arith.constant dense<0.000000e+00> : vector<8x256xf32>
    %25 = tpu.matmul %24, %22, %cst_23 {dimension_numbers = #tpu.dot_dimension_numbers<[1], [0], [0], [1], [0, 0, 1, 1], [], []>} : vector<8x4xbf16>, vector<4x256xbf16>, vector<8x256xf32> -> vector<8x256xf32>
    %26 = arith.addf %16, %25 : vector<8x256xf32>
    %c0_24 = arith.constant 0 : index
    %c0_25 = arith.constant 0 : index
    %c16 = arith.constant 16 : index
    %27 = vector.load %arg1[%c0_24, %c0_25, %c16] : memref<1x4x290xbf16, #tpu.memory_space<vmem>>, vector<1x4x256xbf16>
    %28 = vector.shape_cast %27 : vector<1x4x256xbf16> to vector<4x256xbf16>
    %c0_26 = arith.constant 0 : index
    %c0_27 = arith.constant 0 : index
    %c0_28 = arith.constant 0 : index
    %29 = vector.load %arg2[%c0_26, %c0_27, %c0_28] : memref<2x1x256xbf16, #tpu.memory_space<vmem>>, vector<1x1x256xbf16>
    %30 = vector.shape_cast %29 : vector<1x1x256xbf16> to vector<1x256xbf16>
    %31 = vector.broadcast %30 : vector<1x256xbf16> to vector<4x256xbf16>
    %32 = arith.mulf %28, %31 : vector<4x256xbf16>
    %c3 = arith.constant 3 : index
    %c0_29 = arith.constant 0 : index
    %c0_30 = arith.constant 0 : index
    %33 = vector.load %arg3[%c3, %c0_29, %c0_30] : memref<9x8x4xbf16, #tpu.memory_space<vmem>>, vector<1x8x4xbf16>
    %34 = vector.shape_cast %33 : vector<1x8x4xbf16> to vector<8x4xbf16>
    %cst_31 = arith.constant dense<0.000000e+00> : vector<8x256xf32>
    %35 = tpu.matmul %34, %32, %cst_31 {dimension_numbers = #tpu.dot_dimension_numbers<[1], [0], [0], [1], [0, 0, 1, 1], [], []>} : vector<8x4xbf16>, vector<4x256xbf16>, vector<8x256xf32> -> vector<8x256xf32>
    %36 = arith.addf %26, %35 : vector<8x256xf32>
    %c0_32 = arith.constant 0 : index
    %c0_33 = arith.constant 0 : index
    %c17 = arith.constant 17 : index
    %37 = vector.load %arg1[%c0_32, %c0_33, %c17] : memref<1x4x290xbf16, #tpu.memory_space<vmem>>, vector<1x4x256xbf16>
    %38 = vector.shape_cast %37 : vector<1x4x256xbf16> to vector<4x256xbf16>
    %c4 = arith.constant 4 : index
    %c0_34 = arith.constant 0 : index
    %c0_35 = arith.constant 0 : index
    %39 = vector.load %arg3[%c4, %c0_34, %c0_35] : memref<9x8x4xbf16, #tpu.memory_space<vmem>>, vector<1x8x4xbf16>
    %40 = vector.shape_cast %39 : vector<1x8x4xbf16> to vector<8x4xbf16>
    %cst_36 = arith.constant dense<0.000000e+00> : vector<8x256xf32>
    %41 = tpu.matmul %40, %38, %cst_36 {dimension_numbers = #tpu.dot_dimension_numbers<[1], [0], [0], [1], [0, 0, 1, 1], [], []>} : vector<8x4xbf16>, vector<4x256xbf16>, vector<8x256xf32> -> vector<8x256xf32>
    %42 = arith.addf %36, %41 : vector<8x256xf32>
    %c0_37 = arith.constant 0 : index
    %c0_38 = arith.constant 0 : index
    %c18 = arith.constant 18 : index
    %43 = vector.load %arg1[%c0_37, %c0_38, %c18] : memref<1x4x290xbf16, #tpu.memory_space<vmem>>, vector<1x4x256xbf16>
    %44 = vector.shape_cast %43 : vector<1x4x256xbf16> to vector<4x256xbf16>
    %c1_39 = arith.constant 1 : index
    %c0_40 = arith.constant 0 : index
    %c0_41 = arith.constant 0 : index
    %45 = vector.load %arg2[%c1_39, %c0_40, %c0_41] : memref<2x1x256xbf16, #tpu.memory_space<vmem>>, vector<1x1x256xbf16>
    %46 = vector.shape_cast %45 : vector<1x1x256xbf16> to vector<1x256xbf16>
    %47 = vector.broadcast %46 : vector<1x256xbf16> to vector<4x256xbf16>
    %48 = arith.mulf %44, %47 : vector<4x256xbf16>
    %c5 = arith.constant 5 : index
    %c0_42 = arith.constant 0 : index
    %c0_43 = arith.constant 0 : index
    %49 = vector.load %arg3[%c5, %c0_42, %c0_43] : memref<9x8x4xbf16, #tpu.memory_space<vmem>>, vector<1x8x4xbf16>
    %50 = vector.shape_cast %49 : vector<1x8x4xbf16> to vector<8x4xbf16>
    %cst_44 = arith.constant dense<0.000000e+00> : vector<8x256xf32>
    %51 = tpu.matmul %50, %48, %cst_44 {dimension_numbers = #tpu.dot_dimension_numbers<[1], [0], [0], [1], [0, 0, 1, 1], [], []>} : vector<8x4xbf16>, vector<4x256xbf16>, vector<8x256xf32> -> vector<8x256xf32>
    %52 = arith.addf %42, %51 : vector<8x256xf32>
    %c0_45 = arith.constant 0 : index
    %c0_46 = arith.constant 0 : index
    %c32 = arith.constant 32 : index
    %53 = vector.load %arg1[%c0_45, %c0_46, %c32] : memref<1x4x290xbf16, #tpu.memory_space<vmem>>, vector<1x4x256xbf16>
    %54 = vector.shape_cast %53 : vector<1x4x256xbf16> to vector<4x256xbf16>
    %c0_47 = arith.constant 0 : index
    %c0_48 = arith.constant 0 : index
    %c0_49 = arith.constant 0 : index
    %55 = vector.load %arg2[%c0_47, %c0_48, %c0_49] : memref<2x1x256xbf16, #tpu.memory_space<vmem>>, vector<1x1x256xbf16>
    %56 = vector.shape_cast %55 : vector<1x1x256xbf16> to vector<1x256xbf16>
    %57 = vector.broadcast %56 : vector<1x256xbf16> to vector<4x256xbf16>
    %58 = arith.mulf %54, %57 : vector<4x256xbf16>
    %c6 = arith.constant 6 : index
    %c0_50 = arith.constant 0 : index
    %c0_51 = arith.constant 0 : index
    %59 = vector.load %arg3[%c6, %c0_50, %c0_51] : memref<9x8x4xbf16, #tpu.memory_space<vmem>>, vector<1x8x4xbf16>
    %60 = vector.shape_cast %59 : vector<1x8x4xbf16> to vector<8x4xbf16>
    %cst_52 = arith.constant dense<0.000000e+00> : vector<8x256xf32>
    %61 = tpu.matmul %60, %58, %cst_52 {dimension_numbers = #tpu.dot_dimension_numbers<[1], [0], [0], [1], [0, 0, 1, 1], [], []>} : vector<8x4xbf16>, vector<4x256xbf16>, vector<8x256xf32> -> vector<8x256xf32>
    %62 = arith.addf %52, %61 : vector<8x256xf32>
    %c0_53 = arith.constant 0 : index
    %c0_54 = arith.constant 0 : index
    %c33 = arith.constant 33 : index
    %63 = vector.load %arg1[%c0_53, %c0_54, %c33] : memref<1x4x290xbf16, #tpu.memory_space<vmem>>, vector<1x4x256xbf16>
    %64 = vector.shape_cast %63 : vector<1x4x256xbf16> to vector<4x256xbf16>
    %c7 = arith.constant 7 : index
    %c0_55 = arith.constant 0 : index
    %c0_56 = arith.constant 0 : index
    %65 = vector.load %arg3[%c7, %c0_55, %c0_56] : memref<9x8x4xbf16, #tpu.memory_space<vmem>>, vector<1x8x4xbf16>
    %66 = vector.shape_cast %65 : vector<1x8x4xbf16> to vector<8x4xbf16>
    %cst_57 = arith.constant dense<0.000000e+00> : vector<8x256xf32>
    %67 = tpu.matmul %66, %64, %cst_57 {dimension_numbers = #tpu.dot_dimension_numbers<[1], [0], [0], [1], [0, 0, 1, 1], [], []>} : vector<8x4xbf16>, vector<4x256xbf16>, vector<8x256xf32> -> vector<8x256xf32>
    %68 = arith.addf %62, %67 : vector<8x256xf32>
    %c0_58 = arith.constant 0 : index
    %c0_59 = arith.constant 0 : index
    %c34 = arith.constant 34 : index
    %69 = vector.load %arg1[%c0_58, %c0_59, %c34] : memref<1x4x290xbf16, #tpu.memory_space<vmem>>, vector<1x4x256xbf16>
    %70 = vector.shape_cast %69 : vector<1x4x256xbf16> to vector<4x256xbf16>
    %c1_60 = arith.constant 1 : index
    %c0_61 = arith.constant 0 : index
    %c0_62 = arith.constant 0 : index
    %71 = vector.load %arg2[%c1_60, %c0_61, %c0_62] : memref<2x1x256xbf16, #tpu.memory_space<vmem>>, vector<1x1x256xbf16>
    %72 = vector.shape_cast %71 : vector<1x1x256xbf16> to vector<1x256xbf16>
    %73 = vector.broadcast %72 : vector<1x256xbf16> to vector<4x256xbf16>
    %74 = arith.mulf %70, %73 : vector<4x256xbf16>
    %c8 = arith.constant 8 : index
    %c0_63 = arith.constant 0 : index
    %c0_64 = arith.constant 0 : index
    %75 = vector.load %arg3[%c8, %c0_63, %c0_64] : memref<9x8x4xbf16, #tpu.memory_space<vmem>>, vector<1x8x4xbf16>
    %76 = vector.shape_cast %75 : vector<1x8x4xbf16> to vector<8x4xbf16>
    %cst_65 = arith.constant dense<0.000000e+00> : vector<8x256xf32>
    %77 = tpu.matmul %76, %74, %cst_65 {dimension_numbers = #tpu.dot_dimension_numbers<[1], [0], [0], [1], [0, 0, 1, 1], [], []>} : vector<8x4xbf16>, vector<4x256xbf16>, vector<8x256xf32> -> vector<8x256xf32>
    %78 = arith.addf %68, %77 : vector<8x256xf32>
    %c0_66 = arith.constant 0 : index
    %c0_67 = arith.constant 0 : index
    %79 = vector.load %arg4[%c0_66, %c0_67] : memref<8x1xf32, #tpu.memory_space<vmem>>, vector<8x1xf32>
    %80 = vector.broadcast %79 : vector<8x1xf32> to vector<8x256xf32>
    %81 = arith.addf %78, %80 : vector<8x256xf32>
    %cst_68 = arith.constant 0.000000e+00 : f32
    %82 = vector.broadcast %cst_68 : f32 to vector<8x256xf32>
    %83 = arith.maximumf %81, %82 : vector<8x256xf32>
    %84 = arith.truncf %83 : vector<8x256xf32> to vector<8x256xbf16>
    %cst_69 = arith.constant 0.000000e+00 : bf16
    %85 = vector.broadcast %cst_69 : bf16 to vector<8x290xbf16>
    %c0_70 = arith.constant 0 : index
    %c0_71 = arith.constant 0 : index
    %86 = vector.load %arg9[%c0_70, %c0_71] : memref<8x290xbf16, #tpu.memory_space<vmem>>, vector<8x290xbf16>
    tpu.vector_store %arg9[%c0_70, %c0_71], %85 {strides = array<i32>} : memref<8x290xbf16, #tpu.memory_space<vmem>>, vector<8x290xbf16>,
    %c0_72 = arith.constant 0 : index
    %c17_73 = arith.constant 17 : index
    %87 = vector.load %arg9[%c0_72, %c17_73] : memref<8x290xbf16, #tpu.memory_space<vmem>>, vector<8x256xbf16>
    tpu.vector_store %arg9[%c0_72, %c17_73], %84 {strides = array<i32>} : memref<8x290xbf16, #tpu.memory_space<vmem>>, vector<8x256xbf16>,
    %cst_74 = arith.constant 0.000000e+00 : f32
    %88 = vector.broadcast %cst_74 : f32 to vector<8x256xf32>
    %c0_75 = arith.constant 0 : index
    %c0_76 = arith.constant 0 : index
    %89 = vector.load %arg9[%c0_75, %c0_76] : memref<8x290xbf16, #tpu.memory_space<vmem>>, vector<8x256xbf16>
    %c0_77 = arith.constant 0 : index
    %c0_78 = arith.constant 0 : index
    %c0_79 = arith.constant 0 : index
    %90 = vector.load %arg2[%c0_77, %c0_78, %c0_79] : memref<2x1x256xbf16, #tpu.memory_space<vmem>>, vector<1x1x256xbf16>
    %91 = vector.shape_cast %90 : vector<1x1x256xbf16> to vector<1x256xbf16>
    %92 = vector.broadcast %91 : vector<1x256xbf16> to vector<8x256xbf16>
    %93 = arith.mulf %89, %92 : vector<8x256xbf16>
    %c0_80 = arith.constant 0 : index
    %c0_81 = arith.constant 0 : index
    %c0_82 = arith.constant 0 : index
    %94 = vector.load %arg5[%c0_80, %c0_81, %c0_82] : memref<9x8x8xbf16, #tpu.memory_space<vmem>>, vector<1x8x8xbf16>
    %95 = vector.shape_cast %94 : vector<1x8x8xbf16> to vector<8x8xbf16>
    %cst_83 = arith.constant dense<0.000000e+00> : vector<8x256xf32>
    %96 = tpu.matmul %95, %93, %cst_83 {dimension_numbers = #tpu.dot_dimension_numbers<[1], [0], [0], [1], [0, 0, 1, 1], [], []>} : vector<8x8xbf16>, vector<8x256xbf16>, vector<8x256xf32> -> vector<8x256xf32>
    %97 = arith.addf %88, %96 : vector<8x256xf32>
    %c0_84 = arith.constant 0 : index
    %c1_85 = arith.constant 1 : index
    %98 = vector.load %arg9[%c0_84, %c1_85] : memref<8x290xbf16, #tpu.memory_space<vmem>>, vector<8x256xbf16>
    %c1_86 = arith.constant 1 : index
    %c0_87 = arith.constant 0 : index
    %c0_88 = arith.constant 0 : index
    %99 = vector.load %arg5[%c1_86, %c0_87, %c0_88] : memref<9x8x8xbf16, #tpu.memory_space<vmem>>, vector<1x8x8xbf16>
    %100 = vector.shape_cast %99 : vector<1x8x8xbf16> to vector<8x8xbf16>
    %cst_89 = arith.constant dense<0.000000e+00> : vector<8x256xf32>
    %101 = tpu.matmul %100, %98, %cst_89 {dimension_numbers = #tpu.dot_dimension_numbers<[1], [0], [0], [1], [0, 0, 1, 1], [], []>} : vector<8x8xbf16>, vector<8x256xbf16>, vector<8x256xf32> -> vector<8x256xf32>
    %102 = arith.addf %97, %101 : vector<8x256xf32>
    %c0_90 = arith.constant 0 : index
    %c2_91 = arith.constant 2 : index
    %103 = vector.load %arg9[%c0_90, %c2_91] : memref<8x290xbf16, #tpu.memory_space<vmem>>, vector<8x256xbf16>
    %c1_92 = arith.constant 1 : index
    %c0_93 = arith.constant 0 : index
    %c0_94 = arith.constant 0 : index
    %104 = vector.load %arg2[%c1_92, %c0_93, %c0_94] : memref<2x1x256xbf16, #tpu.memory_space<vmem>>, vector<1x1x256xbf16>
    %105 = vector.shape_cast %104 : vector<1x1x256xbf16> to vector<1x256xbf16>
    %106 = vector.broadcast %105 : vector<1x256xbf16> to vector<8x256xbf16>
    %107 = arith.mulf %103, %106 : vector<8x256xbf16>
    %c2_95 = arith.constant 2 : index
    %c0_96 = arith.constant 0 : index
    %c0_97 = arith.constant 0 : index
    %108 = vector.load %arg5[%c2_95, %c0_96, %c0_97] : memref<9x8x8xbf16, #tpu.memory_space<vmem>>, vector<1x8x8xbf16>
    %109 = vector.shape_cast %108 : vector<1x8x8xbf16> to vector<8x8xbf16>
    %cst_98 = arith.constant dense<0.000000e+00> : vector<8x256xf32>
    %110 = tpu.matmul %109, %107, %cst_98 {dimension_numbers = #tpu.dot_dimension_numbers<[1], [0], [0], [1], [0, 0, 1, 1], [], []>} : vector<8x8xbf16>, vector<8x256xbf16>, vector<8x256xf32> -> vector<8x256xf32>
    %111 = arith.addf %102, %110 : vector<8x256xf32>
    %c0_99 = arith.constant 0 : index
    %c16_100 = arith.constant 16 : index
    %112 = vector.load %arg9[%c0_99, %c16_100] : memref<8x290xbf16, #tpu.memory_space<vmem>>, vector<8x256xbf16>
    %c0_101 = arith.constant 0 : index
    %c0_102 = arith.constant 0 : index
    %c0_103 = arith.constant 0 : index
    %113 = vector.load %arg2[%c0_101, %c0_102, %c0_103] : memref<2x1x256xbf16, #tpu.memory_space<vmem>>, vector<1x1x256xbf16>
    %114 = vector.shape_cast %113 : vector<1x1x256xbf16> to vector<1x256xbf16>
    %115 = vector.broadcast %114 : vector<1x256xbf16> to vector<8x256xbf16>
    %116 = arith.mulf %112, %115 : vector<8x256xbf16>
    %c3_104 = arith.constant 3 : index
    %c0_105 = arith.constant 0 : index
    %c0_106 = arith.constant 0 : index
    %117 = vector.load %arg5[%c3_104, %c0_105, %c0_106] : memref<9x8x8xbf16, #tpu.memory_space<vmem>>, vector<1x8x8xbf16>
    %118 = vector.shape_cast %117 : vector<1x8x8xbf16> to vector<8x8xbf16>
    %cst_107 = arith.constant dense<0.000000e+00> : vector<8x256xf32>
    %119 = tpu.matmul %118, %116, %cst_107 {dimension_numbers = #tpu.dot_dimension_numbers<[1], [0], [0], [1], [0, 0, 1, 1], [], []>} : vector<8x8xbf16>, vector<8x256xbf16>, vector<8x256xf32> -> vector<8x256xf32>
    %120 = arith.addf %111, %119 : vector<8x256xf32>
    %c0_108 = arith.constant 0 : index
    %c17_109 = arith.constant 17 : index
    %121 = vector.load %arg9[%c0_108, %c17_109] : memref<8x290xbf16, #tpu.memory_space<vmem>>, vector<8x256xbf16>
    %c4_110 = arith.constant 4 : index
    %c0_111 = arith.constant 0 : index
    %c0_112 = arith.constant 0 : index
    %122 = vector.load %arg5[%c4_110, %c0_111, %c0_112] : memref<9x8x8xbf16, #tpu.memory_space<vmem>>, vector<1x8x8xbf16>
    %123 = vector.shape_cast %122 : vector<1x8x8xbf16> to vector<8x8xbf16>
    %cst_113 = arith.constant dense<0.000000e+00> : vector<8x256xf32>
    %124 = tpu.matmul %123, %121, %cst_113 {dimension_numbers = #tpu.dot_dimension_numbers<[1], [0], [0], [1], [0, 0, 1, 1], [], []>} : vector<8x8xbf16>, vector<8x256xbf16>, vector<8x256xf32> -> vector<8x256xf32>
    %125 = arith.addf %120, %124 : vector<8x256xf32>
    %c0_114 = arith.constant 0 : index
    %c18_115 = arith.constant 18 : index
    %126 = vector.load %arg9[%c0_114, %c18_115] : memref<8x290xbf16, #tpu.memory_space<vmem>>, vector<8x256xbf16>
    %c1_116 = arith.constant 1 : index
    %c0_117 = arith.constant 0 : index
    %c0_118 = arith.constant 0 : index
    %127 = vector.load %arg2[%c1_116, %c0_117, %c0_118] : memref<2x1x256xbf16, #tpu.memory_space<vmem>>, vector<1x1x256xbf16>
    %128 = vector.shape_cast %127 : vector<1x1x256xbf16> to vector<1x256xbf16>
    %129 = vector.broadcast %128 : vector<1x256xbf16> to vector<8x256xbf16>
    %130 = arith.mulf %126, %129 : vector<8x256xbf16>
    %c5_119 = arith.constant 5 : index
    %c0_120 = arith.constant 0 : index
    %c0_121 = arith.constant 0 : index
    %131 = vector.load %arg5[%c5_119, %c0_120, %c0_121] : memref<9x8x8xbf16, #tpu.memory_space<vmem>>, vector<1x8x8xbf16>
    %132 = vector.shape_cast %131 : vector<1x8x8xbf16> to vector<8x8xbf16>
    %cst_122 = arith.constant dense<0.000000e+00> : vector<8x256xf32>
    %133 = tpu.matmul %132, %130, %cst_122 {dimension_numbers = #tpu.dot_dimension_numbers<[1], [0], [0], [1], [0, 0, 1, 1], [], []>} : vector<8x8xbf16>, vector<8x256xbf16>, vector<8x256xf32> -> vector<8x256xf32>
    %134 = arith.addf %125, %133 : vector<8x256xf32>
    %c0_123 = arith.constant 0 : index
    %c32_124 = arith.constant 32 : index
    %135 = vector.load %arg9[%c0_123, %c32_124] : memref<8x290xbf16, #tpu.memory_space<vmem>>, vector<8x256xbf16>
    %c0_125 = arith.constant 0 : index
    %c0_126 = arith.constant 0 : index
    %c0_127 = arith.constant 0 : index
    %136 = vector.load %arg2[%c0_125, %c0_126, %c0_127] : memref<2x1x256xbf16, #tpu.memory_space<vmem>>, vector<1x1x256xbf16>
    %137 = vector.shape_cast %136 : vector<1x1x256xbf16> to vector<1x256xbf16>
    %138 = vector.broadcast %137 : vector<1x256xbf16> to vector<8x256xbf16>
    %139 = arith.mulf %135, %138 : vector<8x256xbf16>
    %c6_128 = arith.constant 6 : index
    %c0_129 = arith.constant 0 : index
    %c0_130 = arith.constant 0 : index
    %140 = vector.load %arg5[%c6_128, %c0_129, %c0_130] : memref<9x8x8xbf16, #tpu.memory_space<vmem>>, vector<1x8x8xbf16>
    %141 = vector.shape_cast %140 : vector<1x8x8xbf16> to vector<8x8xbf16>
    %cst_131 = arith.constant dense<0.000000e+00> : vector<8x256xf32>
    %142 = tpu.matmul %141, %139, %cst_131 {dimension_numbers = #tpu.dot_dimension_numbers<[1], [0], [0], [1], [0, 0, 1, 1], [], []>} : vector<8x8xbf16>, vector<8x256xbf16>, vector<8x256xf32> -> vector<8x256xf32>
    %143 = arith.addf %134, %142 : vector<8x256xf32>
    %c0_132 = arith.constant 0 : index
    %c33_133 = arith.constant 33 : index
    %144 = vector.load %arg9[%c0_132, %c33_133] : memref<8x290xbf16, #tpu.memory_space<vmem>>, vector<8x256xbf16>
    %c7_134 = arith.constant 7 : index
    %c0_135 = arith.constant 0 : index
    %c0_136 = arith.constant 0 : index
    %145 = vector.load %arg5[%c7_134, %c0_135, %c0_136] : memref<9x8x8xbf16, #tpu.memory_space<vmem>>, vector<1x8x8xbf16>
    %146 = vector.shape_cast %145 : vector<1x8x8xbf16> to vector<8x8xbf16>
    %cst_137 = arith.constant dense<0.000000e+00> : vector<8x256xf32>
    %147 = tpu.matmul %146, %144, %cst_137 {dimension_numbers = #tpu.dot_dimension_numbers<[1], [0], [0], [1], [0, 0, 1, 1], [], []>} : vector<8x8xbf16>, vector<8x256xbf16>, vector<8x256xf32> -> vector<8x256xf32>
    %148 = arith.addf %143, %147 : vector<8x256xf32>
    %c0_138 = arith.constant 0 : index
    %c34_139 = arith.constant 34 : index
    %149 = vector.load %arg9[%c0_138, %c34_139] : memref<8x290xbf16, #tpu.memory_space<vmem>>, vector<8x256xbf16>
    %c1_140 = arith.constant 1 : index
    %c0_141 = arith.constant 0 : index
    %c0_142 = arith.constant 0 : index
    %150 = vector.load %arg2[%c1_140, %c0_141, %c0_142] : memref<2x1x256xbf16, #tpu.memory_space<vmem>>, vector<1x1x256xbf16>
    %151 = vector.shape_cast %150 : vector<1x1x256xbf16> to vector<1x256xbf16>
    %152 = vector.broadcast %151 : vector<1x256xbf16> to vector<8x256xbf16>
    %153 = arith.mulf %149, %152 : vector<8x256xbf16>
    %c8_143 = arith.constant 8 : index
    %c0_144 = arith.constant 0 : index
    %c0_145 = arith.constant 0 : index
    %154 = vector.load %arg5[%c8_143, %c0_144, %c0_145] : memref<9x8x8xbf16, #tpu.memory_space<vmem>>, vector<1x8x8xbf16>
    %155 = vector.shape_cast %154 : vector<1x8x8xbf16> to vector<8x8xbf16>
    %cst_146 = arith.constant dense<0.000000e+00> : vector<8x256xf32>
    %156 = tpu.matmul %155, %153, %cst_146 {dimension_numbers = #tpu.dot_dimension_numbers<[1], [0], [0], [1], [0, 0, 1, 1], [], []>} : vector<8x8xbf16>, vector<8x256xbf16>, vector<8x256xf32> -> vector<8x256xf32>
    %157 = arith.addf %148, %156 : vector<8x256xf32>
    %c0_147 = arith.constant 0 : index
    %c0_148 = arith.constant 0 : index
    %158 = vector.load %arg6[%c0_147, %c0_148] : memref<8x4xbf16, #tpu.memory_space<vmem>>, vector<8x4xbf16>
    %c0_149 = arith.constant 0 : index
    %c0_150 = arith.constant 0 : index
    %c17_151 = arith.constant 17 : index
    %159 = vector.load %arg1[%c0_149, %c0_150, %c17_151] : memref<1x4x290xbf16, #tpu.memory_space<vmem>>, vector<1x4x256xbf16>
    %160 = vector.shape_cast %159 : vector<1x4x256xbf16> to vector<4x256xbf16>
    %cst_152 = arith.constant dense<0.000000e+00> : vector<8x256xf32>
    %161 = tpu.matmul %158, %160, %cst_152 {dimension_numbers = #tpu.dot_dimension_numbers<[1], [0], [0], [1], [0, 0, 1, 1], [], []>} : vector<8x4xbf16>, vector<4x256xbf16>, vector<8x256xf32> -> vector<8x256xf32>
    %162 = arith.addf %157, %161 : vector<8x256xf32>
    %c0_153 = arith.constant 0 : index
    %c0_154 = arith.constant 0 : index
    %163 = vector.load %arg7[%c0_153, %c0_154] : memref<8x1xf32, #tpu.memory_space<vmem>>, vector<8x1xf32>
    %164 = vector.broadcast %163 : vector<8x1xf32> to vector<8x256xf32>
    %165 = arith.addf %162, %164 : vector<8x256xf32>
    %c0_155 = arith.constant 0 : index
    %c0_156 = arith.constant 0 : index
    %c0_157 = arith.constant 0 : index
    %166 = vector.load %arg8[%c0_155, %c0_156, %c0_157] : memref<1x8x256xf32, #tpu.memory_space<vmem>>, vector<1x8x256xf32>
    %167 = vector.shape_cast %166 : vector<1x8x256xf32> to vector<8x256xf32>
    %168 = vector.shape_cast %165 : vector<8x256xf32> to vector<1x8x256xf32>
    tpu.vector_store %arg8[%c0_155, %c0_156, %c0_157], %168 {strides = array<i32>} : memref<1x8x256xf32, #tpu.memory_space<vmem>>, vector<1x8x256xf32>,
    return
  }
  func.func @transform_0(%arg0: i32) -> (i32, i32, i32) {
    %c0_i32 = arith.constant 0 : i32
    %c0_i32_0 = arith.constant 0 : i32
    %c0_i32_1 = arith.constant 0 : i32
    return %arg0, %c0_i32, %c0_i32_0 : i32, i32, i32
  }
  func.func @transform_1(%arg0: i32) -> (i32, i32, i32) {
    %c0_i32 = arith.constant 0 : i32
    %c0_i32_0 = arith.constant 0 : i32
    %c0_i32_1 = arith.constant 0 : i32
    %c0_i32_2 = arith.constant 0 : i32
    return %c0_i32, %c0_i32_0, %c0_i32_1 : i32, i32, i32
  }
  func.func @transform_2(%arg0: i32) -> (i32, i32, i32) {
    %c0_i32 = arith.constant 0 : i32
    %c0_i32_0 = arith.constant 0 : i32
    %c0_i32_1 = arith.constant 0 : i32
    %c0_i32_2 = arith.constant 0 : i32
    return %c0_i32, %c0_i32_0, %c0_i32_1 : i32, i32, i32
  }
  func.func @transform_3(%arg0: i32) -> (i32, i32) {
    %c0_i32 = arith.constant 0 : i32
    %c0_i32_0 = arith.constant 0 : i32
    %c0_i32_1 = arith.constant 0 : i32
    return %c0_i32, %c0_i32_0 : i32, i32
  }
  func.func @transform_4(%arg0: i32) -> (i32, i32, i32) {
    %c0_i32 = arith.constant 0 : i32
    %c0_i32_0 = arith.constant 0 : i32
    %c0_i32_1 = arith.constant 0 : i32
    %c0_i32_2 = arith.constant 0 : i32
    return %c0_i32, %c0_i32_0, %c0_i32_1 : i32, i32, i32
  }
  func.func @transform_5(%arg0: i32) -> (i32, i32) {
    %c0_i32 = arith.constant 0 : i32
    %c0_i32_0 = arith.constant 0 : i32
    %c0_i32_1 = arith.constant 0 : i32
    return %c0_i32, %c0_i32_0 : i32, i32
  }
  func.func @transform_6(%arg0: i32) -> (i32, i32) {
    %c0_i32 = arith.constant 0 : i32
    %c0_i32_0 = arith.constant 0 : i32
    %c0_i32_1 = arith.constant 0 : i32
    return %c0_i32, %c0_i32_0 : i32, i32
  }
  func.func @transform_7(%arg0: i32) -> (i32, i32, i32) {
    %c0_i32 = arith.constant 0 : i32
    %c0_i32_0 = arith.constant 0 : i32
    %c0_i32_1 = arith.constant 0 : i32
    return %arg0, %c0_i32, %c0_i32_0 : i32, i32, i32
  }
}

</mosaic_0001>

<bundles_post_ra>
// kernel: dblock_forward.1
= control target key start
LH: loop header
LB: loop body
LE: loop exit
PB: predicated region body
PF: predicated region fallthrough
CT: control target
= control target key end

     0   :  { %s2239_s24 = smov 0   ;;  %s2581_s0 = inlined_call_operand.vmem [shape: bf16[2,4,290], index: 0, kind: input, shape index: {}]   ;;  %s2582_s1 = inlined_call_operand.vmem [shape: bf16[2,1,256], index: 1, kind: input, shape index: {}]   ;;  %s2583_s2 = inlined_call_operand.vmem [shape: bf16[9,8,4], index: 2, kind: input, shape index: {}]   ;;  %s2584_s3 = inlined_call_operand.vmem [shape: f32[8,1], index: 3, kind: input, shape index: {}]   ;;  %s2585_s4 = inlined_call_operand.vmem [shape: bf16[9,8,8], index: 4, kind: input, shape index: {}]   ;;  %s2586_s5 = inlined_call_operand.vmem [shape: bf16[8,4], index: 5, kind: input, shape index: {}]   ;;  %s2587_s6 = inlined_call_operand.vmem [shape: f32[8,1], index: 6, kind: input, shape index: {}]   ;;  %s2588_s7 = inlined_call_operand.vmem [shape: f32[2,8,256], index: 7, kind: output, shape index: {}]  }
   0x1 LB: > { %s2040_s25 = sadd.s32 4294967295, %s2180_s24   ;;  %p2044_p0 = scmp.ge.s32.totalorder %s2180_s24, 1  ;;  %s2180_s24 = sphi %s2239_s24, %s17_s24  }
   0x2   : > { %p237_p1 = scmp.lt.s32.totalorder %s2180_s24, 3 }
   0x4   : > { %p238_p2 = pnand %p2044_p0, %p237_p1 }
   0x5   : > { %v294_v0 = vlaneseq (!%p238_p2)  ;;  %v2182_v1 = vmov (!%p238_p2), 1966171168   ;;  %v2055_v3 = vld.sshfl [vmem:[%s2582_s1 + $0x2] sm:$0x11 pattern:$0x75316420] (!%p238_p2) }
   0x6   : > { %241 = sbr.rel (%p238_p2) target bundleno = 1039 (0x40f), region = 48  ;;  %v292_v2 = vunpack.c.l.s4 (!%p238_p2), %v2182_v1  ;;  %v2183_v5 = vmov (!%p238_p2), 1983009808   ;;  %v483_v9 = vcombine.high (!%p238_p2), %v2055_v3, %v2055_v3  ;;  %p269_p3 = scmp.lt.s32.totalorder (!%p238_p2), %s2040_s25, 1  ;;  %vm2590_vm0 = vcmask (!%p238_p2), 1041408  }
   0x7   : > { %v295_v4 = vshrl.u32 (!%p238_p2), %v294_v0, 7  ;;  %v323_v6 = vunpack.c.l.s4 (!%p238_p2), %v2183_v5  ;;  %v2048_v7 = vld.sshfl [vmem:[%s2582_s1] sm:$0x11 pattern:$0x75316420] (!%p238_p2)  ;;  %s2184_s11 = smov (!%p238_p2), 18  }
   0x8   : > { %v293_v8 = vunpack.c.0.s8 (!%p238_p2), %v292_v2  ;;  %v290_v10 = vcombine.high (!%p238_p2), %v2048_v7, %v2048_v7  ;;  %s2185_s12 = smov (!%p238_p2), 2   ;;  %s2186_s13 = smov (!%p238_p2), 32   ;;  %v2191_v46 = vmov (!%p238_p2), 0   ;;  %vm525_vm1 = vcmask (!%p238_p2), 15360   ;;  %v331_v51 = vld [vmem:[%s2583_s2] sm:$0xf] (!%p238_p2) }
   0x9   : > { %v310_v12 = vsub.s32 (!%p238_p2), 0, %v295_v4  ;;  %v324_v13 = vunpack.c.0.s8 (!%p238_p2), %v323_v6  ;;  %s2187_s14 = smov (!%p238_p2), 16   ;;  %s2188_s15 = smov (!%p238_p2), 34   ;;  %404 = vmatprep.mubr.bf16.mxu0 (!%p238_p2), %v2191_v46  ;;  %1135 = vst [vmem:[#allocation2] sm:$0xff] (!%p238_p2), %v2191_v46  ;;  %463 = vmatprep.mubr.bf16.mxu1 (!%p238_p2), %v2191_v46  ;;  %vm2589_vm2 = vcmask (!%p238_p2), 31744   ;;  %vm782_vm3 = vcmask (!%p238_p2), 146432  }
   0xa   : > { %v296_v11 = vsub.s32 (!%p238_p2), %v293_v8, %v295_v4  ;;  %s2189_s16 = smov (!%p238_p2), 127   ;;  %s2190_s17 = smov (!%p238_p2), 111   ;;  %2164 = vset.pattern.permute.xlu1 (!%p238_p2), %v2191_v46  ;;  %2165 = vset.pattern.permute.xlu0 (!%p238_p2), %v2191_v46  ;;  %vm870_vm4 = vcmask (!%p238_p2), 261120   ;;  %vm613_vm5 = vcmask (!%p238_p2), 130048   ;;  %vm358_vm6 = vcmask (!%p238_p2), 1039360  }
   0xb   : > { %v2255_v22 = vsub.s32 (!%p238_p2), %v324_v13, %v295_v4  ;;  %s2192_s20 = smov (!%p238_p2), 126   ;;  %s2193_s21 = smov (!%p238_p2), 96   ;;  %vm1039_vm7 = vcmask (!%p238_p2), 277504   ;;  %vm554_vm8 = vcmask (!%p238_p2), 1031168   ;;  %vm723_vm9 = vcmask (!%p238_p2), 908288  }
   0xc   : > { %v490_v14 = vrot.slane (!%p238_p2), %v2055_v3, %v296_v11  ;;  %v497_v15 = vrot.slane (!%p238_p2), %v483_v9, %v296_v11  ;;  %v297_v16 = vrot.slane (!%p238_p2), %v2048_v7, %v296_v11  ;;  %v304_v17 = vrot.slane (!%p238_p2), %v290_v10, %v296_v11  ;;  %s2194_s22 = smov (!%p238_p2), 112   ;;  %s2195_s27 = smov (!%p238_p2), 110  }
   0xd   : > { %s2604_s25 = smov (!%p269_p3, %s2040_s25), 1  ;;  %s2196_s28 = smov 95   ;;  %vm642_vm10 = vcmask 916480   ;;  %vm811_vm11 = vcmask 900096   ;;  %vm2592_vm12 = vcmask 785408   ;;  %vm2593_vm13 = vcmask 777216  }
   0xe   : > { %v499_v18 = vpack.i.b16 %v490_v14, %v490_v14  ;;  %v506_v19 = vpack.i.b16 %v497_v15, %v497_v15  ;;  %v306_v20 = vpack.i.b16 %v297_v16, %v297_v16  ;;  %v313_v21 = vpack.i.b16 %v304_v17, %v304_v17  ;;  %s2138_s30 = smul.u32 6, %s2604_s25  ;;  %s2197_s29 = smov 94  }
   0xf   : > { %vm2591_vm14 = vcmask 769024   ;;  %vm1136_vm15 = vcmask 273408   ;;  %s2198_s18 = smov 17  }
  0x10   : > { %v504_v23 = vrot.slane %v499_v18, %v310_v12  ;;  %v511_v24 = vrot.slane %v506_v19, %v310_v12  ;;  %v311_v25 = vrot.slane %v306_v20, %v310_v12  ;;  %v318_v26 = vrot.slane %v313_v21, %v310_v12  ;;  %s2267_s10 = scalar_lea.vmem %s2581_s0, %s2138_s30  ;;  %v2049_v18 = vld [vmem:[%s2583_s2 + $0x4] sm:$0xf]  ;;  %1137 = vst.msk [vmem:[#allocation2 + $0x8] sm:$0xf] %vm1136_vm15, %v2191_v46 }
  0x11   : > { %v332_v31 = vld [vmem:[%s2267_s10] sm:$0x3f]  ;;  %vm1150_vm15 = vcmask 1043592  }
  0x12   : > { %v2258_v27 = vcombine.low %v504_v23, %v511_v24  ;;  %v2260_v28 = vcombine.low %v311_v25, %v318_v26  ;;  %v343_v32 = vrot.slane %v332_v31, %v2255_v22  ;;  %v336_v33 = vcombine.high %v332_v31, %v332_v31  ;;  %v697_v34 = vld [vmem:[%s2267_s10] sm:$0x3f] }
  0x13   : > { %v708_v37 = vrot.slane %v697_v34, %v2255_v22  ;;  %v701_v38 = vcombine.high %v697_v34, %v697_v34  ;;  %v280_v41 = vld [vmem:[%s2267_s10] sm:$0xf] }
  0x14   : > { %v521_v29 = vrot.slane %v2258_v27, %v2255_v22  ;;  %v328_v30 = vrot.slane %v2260_v28, %v2255_v22  ;;  %v351_v35 = vcombine.high %v343_v32, %v343_v32  ;;  %v350_v36 = vrot.slane %v336_v33, %v2255_v22  ;;  %v472_v49 = vld [vmem:[%s2267_s10] sm:$0x3f] }
  0x15   : > { %v716_v39 = vcombine.high %v708_v37, %v708_v37  ;;  %v715_v40 = vrot.slane %v701_v38, %v2255_v22  ;;  %v866_v56 = vld [vmem:[%s2267_s10] sm:$0x3f] }
  0x16   : > { %779 = vrot.lane.b32.xlu1 %v521_v29, %s2184_s11  ;;  %522 = vrot.lane.b32.xlu0 %v521_v29, %s2185_s12  ;;  %v330_v42 = vmul.bf16 %v328_v30, %v280_v41  ;;  %v609_v59 = vld [vmem:[%s2267_s10] sm:$0x3f] }
  0x17   : > { %v778_v62 = vld [vmem:[%s2267_s10] sm:$0x3f] }
  0x18   : > { %v420_v43 = vrot.slane %v330_v42, %v2255_v22  ;;  %v954_v12 = vld [vmem:[%s2267_s10] sm:$0x3f] }
  0x19   : > { %v965_v19 = vrot.slane %v954_v12, %v2255_v22 }
  0x1a   : > { %867 = vrot.lane.b32.xlu1 %v328_v30, %s2186_s13  ;;  %610 = vrot.lane.b32.xlu0 %v328_v30, %s2187_s14  ;;  %v421_v44 = vcombine.high %v420_v43, %v420_v43  ;;  %v426_v45 = vsel %vm2590_vm0, %v420_v43, 0 }
  0x1b   : > { %v973_v24 = vcombine.high %v965_v19, %v965_v19 }
  0x1c   : > { %2052 = vmatprep.subr.msk.bf16.mxu1 %vm2590_vm0, %v421_v44  ;;  %v1123_v44 = vld [vmem:[%s2584_s3] sm:$0xff] }
  0x1d   : > { %432 = vmatpush1.bf16.msra.mxu1 %v426_v45 }
  0x1e   : > { %1036 = vrot.lane.b32.xlu0 %v521_v29, %s2188_s15  ;;  %352 = vrot.lane.b32.xlu1 %v343_v32, %s2189_s16  ;;  %v1035_v29 = vld [vmem:[%s2267_s10] sm:$0x3f] }
  0x20   : > { %2053 = vmatmul.mubr.msk.bf16.vlgmr.msra.gmra.mrb[0].mxu1 %vm2589_vm2, %v331_v51 }
  0x21   : > { %686 = vmatprep.mubr.bf16.mxu1 %v2191_v46 }
  0x22   : > { %354 = vrot.lane.b32.xlu0 %v351_v35, %s2189_s16  ;;  %356 = vrot.lane.b32.xlu1 %v350_v36, %s2189_s16 }
  0x26   : > { %717 = vrot.lane.b32.xlu0 %v708_v37, %s2190_s17  ;;  %719 = vrot.lane.b32.xlu1 %v716_v39, %s2190_s17  ;;  %v958_v39 = vcombine.high %v954_v12, %v954_v12  ;;  %v2065_v12 = vld [vmem:[%s2583_s2 + $0x14] sm:$0xf] }
  0x28   : > { %v972_v42 = vrot.slane %v958_v39, %v2255_v22 }
  0x2a   : > { %721 = vrot.lane.b32.xlu0 %v715_v40, %s2190_s17 }
  0x88   : > { %v780_v47 = vpop.permute.xlu1 %779  ;;  %v523_v48 = vpop.permute.xlu0 %522 }
  0x89   : > { %v524_v50 = vrot.slane %v523_v48, 6  ;;  %v781_v52 = vrot.slane %v780_v47, 6 }
  0x8b   : > { %v526_v53 = vsel %vm525_vm1, %v524_v50, %v523_v48  ;;  %v783_v63 = vsel %vm782_vm3, %v781_v52, %v780_v47 }
  0x8c   : > { %v528_v54 = vmul.bf16 %v526_v53, %v472_v49  ;;  %v868_v55 = vpop.permute.xlu1 %867  ;;  %v611_v57 = vpop.permute.xlu0 %610  ;;  %v785_v6 = vmul.bf16 %v783_v63, %v778_v62 }
  0x8d   : > { %v869_v58 = vrot.slane %v868_v55, 6  ;;  %v612_v60 = vrot.slane %v611_v57, 6 }
  0x8e   : > { %v539_v61 = vrot.slane %v528_v54, %v2255_v22  ;;  %v532_v7 = vcombine.high %v528_v54, %v528_v54  ;;  %v796_v16 = vrot.slane %v785_v6, %v2255_v22  ;;  %v789_v31 = vcombine.high %v785_v6, %v785_v6 }
  0x8f   : > { %v871_v0 = vsel %vm870_vm4, %v869_v58, %v868_v55  ;;  %v614_v1 = vsel %vm613_vm5, %v612_v60, %v611_v57 }
  0x90   : > { %v873_v2 = vmul.bf16 %v871_v0, %v866_v56  ;;  %v616_v3 = vmul.bf16 %v614_v1, %v609_v59  ;;  %548 = vrot.lane.b32.xlu0 %v539_v61, %s2192_s20  ;;  %v1037_v4 = vpop.permute.xlu0 %1036  ;;  %v353_v5 = vpop.permute.xlu1 %352  ;;  %v546_v15 = vrot.slane %v532_v7, %v2255_v22  ;;  %v547_v23 = vcombine.high %v539_v61, %v539_v61  ;;  %v2056_v61 = vld [vmem:[%s2583_s2 + $0x8] sm:$0xf]  ;;  %v2062_v7 = vld [vmem:[%s2583_s2 + $0x10] sm:$0xf] }
  0x91   : > { %v1038_v25 = vrot.slane %v1037_v4, 6  ;;  %v804_v33 = vcombine.high %v796_v16, %v796_v16  ;;  %v803_v36 = vrot.slane %v789_v31, %v2255_v22 }
  0x92   : > { %v884_v8 = vrot.slane %v873_v2, %v2255_v22  ;;  %v627_v9 = vrot.slane %v616_v3, %v2255_v22  ;;  %v620_v20 = vcombine.high %v616_v3, %v616_v3  ;;  %v877_v32 = vcombine.high %v873_v2, %v873_v2  ;;  %v2059_v3 = vld [vmem:[%s2583_s2 + $0xc] sm:$0xf] }
  0x93   : > { %v1040_v30 = vsel %vm1039_vm7, %v1038_v25, %v1037_v4 }
  0x94   : > { %893 = vrot.lane.b32.xlu0 %v884_v8, %s2193_s21  ;;  %636 = vrot.lane.b32.xlu1 %v627_v9, %s2194_s22  ;;  %v355_v10 = vpop.permute.xlu0 %354  ;;  %v357_v11 = vpop.permute.xlu1 %356  ;;  %v635_v21 = vcombine.high %v627_v9, %v627_v9  ;;  %v634_v26 = vrot.slane %v620_v20, %v2255_v22  ;;  %v1042_v34 = vmul.bf16 %v1040_v30, %v1035_v29 }
  0x95   : > { %v360_v13 = vsel %vm358_vm6, %v355_v10, %v357_v11  ;;  %v359_v14 = vsel %vm358_vm6, %v353_v5, %v355_v10  ;;  %v891_v35 = vrot.slane %v877_v32, %v2255_v22  ;;  %v892_v40 = vcombine.high %v884_v8, %v884_v8  ;;  %v2074_v32 = vld [vmem:[%s2583_s2 + $0x20] sm:$0xf] }
  0x96   : > { %2050 = vmatprep.subr.msk.bf16.mxu0 %vm2590_vm0, %v360_v13  ;;  %v367_v17 = vsel %vm2590_vm0, %v359_v14, 0  ;;  %v1046_v37 = vcombine.high %v1042_v34, %v1042_v34  ;;  %v1053_v38 = vrot.slane %v1042_v34, %v2255_v22 }
  0x97   : > { %373 = vmatpush1.bf16.msra.mxu0 %v367_v17 }
  0x98   : > { %552 = vrot.lane.b32.xlu0 %v546_v15, %s2192_s20  ;;  %805 = vrot.lane.b32.xlu1 %v796_v16, %s2195_s27  ;;  %v1060_v41 = vrot.slane %v1046_v37, %v2255_v22  ;;  %v1061_v43 = vcombine.high %v1053_v38, %v1053_v38  ;;  %v718_v45 = vpop.permute.xlu0 %717  ;;  %v720_v48 = vpop.permute.xlu1 %719 }
  0x9a   : > { %2051 = vmatmul.mubr.msk.bf16.vlgmr.msra.gmra.mrb[0].mxu0 %vm2589_vm2, %v2049_v18 }
  0x9b   : > { %598 = vmatprep.mubr.bf16.mxu0 %v2191_v46 }
  0x9c   : > { %638 = vrot.lane.b32.xlu0 %v635_v21, %s2194_s22  ;;  %550 = vrot.lane.b32.xlu1 %v547_v23, %s2192_s20  ;;  %v722_v47 = vpop.permute.xlu0 %721 }
  0x9d   : > { %v725_v59 = vsel %vm723_vm9, %v720_v48, %v722_v47 }
  0xa0   : > { %976 = vrot.lane.b32.xlu0 %v973_v24, %s2196_s28  ;;  %640 = vrot.lane.b32.xlu1 %v634_v26, %s2194_s22  ;;  %v2071_v24 = vld [vmem:[%s2583_s2 + $0x1c] sm:$0xf] }
  0xa4   : > { %807 = vrot.lane.b32.xlu0 %v804_v33, %s2195_s27  ;;  %974 = vrot.lane.b32.xlu1 %v965_v19, %s2196_s28  ;;  %v2068_v19 = vld [vmem:[%s2583_s2 + $0x18] sm:$0xf] }
  0xa8   : > { %897 = vrot.lane.b32.xlu0 %v891_v35, %s2193_s21  ;;  %809 = vrot.lane.b32.xlu1 %v803_v36, %s2195_s27 }
  0xac   : > { %1062 = vrot.lane.b32.xlu0 %v1053_v38, %s2197_s29  ;;  %895 = vrot.lane.b32.xlu1 %v892_v40, %s2193_s21 }
  0xb0   : > { %1066 = vrot.lane.b32.xlu0 %v1060_v41, %s2197_s29  ;;  %978 = vrot.lane.b32.xlu1 %v972_v42, %s2196_s28 }
  0xb4   : > { %1064 = vrot.lane.b32.xlu1 %v1061_v43, %s2197_s29 }
  0xb8   : > { %1126 = vperm.xlu1 %2164, %v1123_v44  }
  0xbc   : > { %1372 = vrot.lane.b32.xlu1 %v2258_v27, %s2185_s12 }
  0xc0   : > { %1600 = vrot.lane.b32.xlu1 %v2258_v27, %s2184_s11 }
  0xc4   : > { %1818 = vrot.lane.b32.xlu1 %v2258_v27, %s2188_s15  ;;  %v724_v27 = vsel %vm723_vm9, %v718_v45, %v720_v48 }
  0xc5   : > { %v730_v1 = vsel %vm2590_vm0, %v724_v27, 0 }
  0xf3   : > { %v465_v33 = vpop.f32.mrb[0].mxu1 }
  0xf4   : > { %v467_v34 = vpop.f32.mrb[1].mxu1 }
  0xf5   : > { %v469_v35 = vpop.f32.mrb[2].mxu1 }
  0xf6   : > { %v470_v36 = vpop.f32.mrb[3].mxu1 }
 0x102   : > { %v549_v49 = vpop.permute.xlu0 %548 }
 0x106   : > { %v894_v50 = vpop.permute.xlu0 %893  ;;  %v637_v51 = vpop.permute.xlu1 %636 }
 0x10a   : > { %v553_v52 = vpop.permute.xlu0 %552  ;;  %v806_v53 = vpop.permute.xlu1 %805 }
 0x10e   : > { %v639_v54 = vpop.permute.xlu0 %638  ;;  %v551_v55 = vpop.permute.xlu1 %550 }
 0x10f   : > { %v555_v56 = vsel %vm554_vm8, %v549_v49, %v551_v55  ;;  %v556_v57 = vsel %vm554_vm8, %v551_v55, %v553_v52  ;;  %v643_v60 = vsel %vm642_vm10, %v637_v51, %v639_v54 }
 0x110   : > { %v561_v58 = vsel %vm2590_vm0, %v555_v56, 0  ;;  %2057 = vmatprep.subr.msk.bf16.mxu0 %vm2590_vm0, %v556_v57  ;;  %v649_v2 = vsel %vm2590_vm0, %v643_v60, 0 }
 0x111   : > { %567 = vmatpush1.bf16.msra.mxu0 %v561_v58 }
 0x112   : > { %v977_v62 = vpop.permute.xlu0 %976  ;;  %2063 = vmatprep.subr.msk.bf16.mxu0 %vm2590_vm0, %v725_v59  ;;  %v641_v63 = vpop.permute.xlu1 %640 }
 0x113   : > { %v644_v0 = vsel %vm642_vm10, %v639_v54, %v641_v63 }
 0x114   : > { %2058 = vmatmul.mubr.msk.bf16.vlgmr.msra.gmra.mrb[4].mxu0 %vm2589_vm2, %v2056_v61  ;;  %2060 = vmatprep.subr.msk.bf16.mxu1 %vm2590_vm0, %v644_v0 }
 0x115   : > { %655 = vmatpush1.bf16.msra.mxu1 %v649_v2  ;;  %736 = vmatpush1.bf16.msra.mxu0 %v730_v1 }
 0x116   : > { %v808_v4 = vpop.permute.xlu0 %807  ;;  %v975_v5 = vpop.permute.xlu1 %974  ;;  %767 = vmatprep.mubr.bf16.mxu0 %v2191_v46 }
 0x117   : > { %v812_v6 = vsel %vm811_vm11, %v806_v53, %v808_v4  ;;  %v981_v18 = vsel %vm2593_vm13, %v975_v5, %v977_v62 }
 0x118   : > { %2061 = vmatmul.mubr.msk.bf16.vlgmr.msra.gmra.mrb[4].mxu1 %vm2589_vm2, %v2059_v3  ;;  %v818_v11 = vsel %vm2590_vm0, %v812_v6, 0  ;;  %v987_v23 = vsel %vm2590_vm0, %v981_v18, 0 }
 0x119   : > { %855 = vmatprep.mubr.bf16.mxu1 %v2191_v46 }
 0x11a   : > { %v898_v8 = vpop.permute.xlu0 %897  ;;  %v810_v9 = vpop.permute.xlu1 %809 }
 0x11b   : > { %v813_v10 = vsel %vm811_vm11, %v808_v4, %v810_v9 }
 0x11c   : > { %2064 = vmatmul.mubr.msk.bf16.vlgmr.msra.gmra.mrb[8].mxu0 %vm2589_vm2, %v2062_v7  ;;  %2066 = vmatprep.subr.msk.bf16.mxu1 %vm2590_vm0, %v813_v10 }
 0x11d   : > { %824 = vmatpush1.bf16.msra.mxu1 %v818_v11  ;;  %943 = vmatprep.mubr.bf16.mxu0 %v2191_v46 }
 0x11e   : > { %v896_v13 = vpop.permute.xlu1 %895  ;;  %v1063_v16 = vpop.permute.xlu0 %1062 }
 0x11f   : > { %v900_v14 = vsel %vm2592_vm12, %v894_v50, %v896_v13  ;;  %v901_v15 = vsel %vm2592_vm12, %v896_v13, %v898_v8 }
 0x120   : > { %v906_v17 = vsel %vm2590_vm0, %v900_v14, 0  ;;  %2067 = vmatmul.mubr.msk.bf16.vlgmr.msra.gmra.mrb[8].mxu1 %vm2589_vm2, %v2065_v12  ;;  %2069 = vmatprep.subr.msk.bf16.mxu0 %vm2590_vm0, %v901_v15 }
 0x121   : > { %912 = vmatpush1.bf16.msra.mxu0 %v906_v17  ;;  %1024 = vmatprep.mubr.bf16.mxu1 %v2191_v46 }
 0x122   : > { %v979_v20 = vpop.permute.xlu1 %978  ;;  %v1067_v25 = vpop.permute.xlu0 %1066 }
 0x123   : > { %v982_v21 = vsel %vm2593_vm13, %v977_v62, %v979_v20  ;;  %vm1226_vm13 = vcmask 1043456  }
 0x124   : > { %2070 = vmatmul.mubr.msk.bf16.vlgmr.msra.gmra.mrb[12].mxu0 %vm2589_vm2, %v2068_v19  ;;  %2072 = vmatprep.subr.msk.bf16.mxu1 %vm2590_vm0, %v982_v21 }
 0x125   : > { %993 = vmatpush1.bf16.msra.mxu1 %v987_v23  ;;  %1112 = vmatprep.mubr.bf16.mxu0 %v2191_v46 }
 0x126   : > { %v1065_v26 = vpop.permute.xlu1 %1064 }
 0x127   : > { %v1069_v29 = vsel %vm2591_vm14, %v1063_v16, %v1065_v26  ;;  %v1070_v30 = vsel %vm2591_vm14, %v1065_v26, %v1067_v25  ;;  %vm1154_vm14 = vcmask 134144  }
 0x128   : > { %v1075_v31 = vsel %vm2590_vm0, %v1069_v29, 0  ;;  %2073 = vmatmul.mubr.msk.bf16.vlgmr.msra.gmra.mrb[12].mxu1 %vm2589_vm2, %v2071_v24  ;;  %2075 = vmatprep.subr.msk.bf16.mxu0 %vm2590_vm0, %v1070_v30  ;;  %vm1146_vm0 = vcmask 138240  }
 0x129   : > { %1081 = vmatpush1.bf16.msra.mxu0 %v1075_v31  ;;  %1265 = vmatprep.mubr.bf16.mxu1 %v2191_v46 }
 0x12c   : > { %2076 = vmatmul.mubr.msk.bf16.vlgmr.msra.gmra.mrb[16].mxu0 %vm2589_vm2, %v2074_v32  ;;  %vm1151_vm2 = vcmask 1047556  }
 0x12d   : > { %1320 = vmatprep.mubr.bf16.mxu0 %v2191_v46  ;;  %vm1152_vm12 = vmor %vm1151_vm2, %vm1150_vm15 }
 0x137   : > { %v1127_v16 = vpop.permute.xlu1 %1126 }
 0x16d   : > { %v406_v37 = vpop.f32.mrb[0].mxu0 }
 0x16e   : > { %v408_v38 = vpop.f32.mrb[1].mxu0  ;;  %v466_v39 = vadd.f32 %v465_v33, %v406_v37 }
 0x16f   : > { %v410_v40 = vpop.f32.mrb[2].mxu0  ;;  %v468_v41 = vadd.f32 %v467_v34, %v408_v38 }
 0x170   : > { %v411_v42 = vpop.f32.mrb[3].mxu0 }
 0x171   : > { %v1373_v42 = vpop.permute.xlu1 %1372 }
 0x1e7   : > { %v600_v43 = vpop.f32.mrb[4].mxu0 }
 0x1e8   : > { %v607_v44 = vadd.f32 %v600_v43, %v466_v39  ;;  %v602_v45 = vpop.f32.mrb[5].mxu0  ;;  %v1374_v43 = vrot.slane %v1373_v42, 4 }
 0x1e9   : > { %v608_v47 = vadd.f32 %v602_v45, %v468_v41  ;;  %v604_v48 = vpop.f32.mrb[6].mxu0 }
 0x1ea   : > { %v605_v49 = vpop.f32.mrb[7].mxu0 }
 0x1eb   : > { %v688_v50 = vpop.f32.mrb[4].mxu1 }
 0x1ec   : > { %v695_v51 = vadd.f32 %v688_v50, %v607_v44  ;;  %v690_v52 = vpop.f32.mrb[5].mxu1 }
 0x1ed   : > { %v696_v53 = vadd.f32 %v690_v52, %v608_v47  ;;  %v692_v54 = vpop.f32.mrb[6].mxu1 }
 0x1ee   : > { %v693_v55 = vpop.f32.mrb[7].mxu1 }
 0x1ef   : > { %v769_v56 = vpop.f32.mrb[8].mxu0 }
 0x1f0   : > { %v776_v57 = vadd.f32 %v769_v56, %v695_v51  ;;  %v771_v58 = vpop.f32.mrb[9].mxu0  ;;  %v1601_v51 = vpop.permute.xlu1 %1600  ;;  %v1375_v56 = vsel %vm525_vm1, %v1374_v43, %v1373_v42  ;;  %vm2594_vm1 = vcmask 777216  }
 0x1f1   : > { %v777_v27 = vadd.f32 %v771_v58, %v696_v53  ;;  %v773_v59 = vpop.f32.mrb[10].mxu0  ;;  %v1602_v52 = vrot.slane %v1601_v51, 4  ;;  %vm2595_vm2 = vmmov %vm2594_vm1 }
 0x1f2   : > { %v774_v60 = vpop.f32.mrb[11].mxu0 }
 0x1f3   : > { %v857_v61 = vpop.f32.mrb[8].mxu1 }
 0x1f4   : > { %v864_v62 = vadd.f32 %v857_v61, %v776_v57  ;;  %v859_v63 = vpop.f32.mrb[9].mxu1  ;;  %v1202_v57 = vld [vmem:[%s2585_s4] sm:$0xf] }
 0x1f5   : > { %v865_v0 = vadd.f32 %v859_v63, %v777_v27  ;;  %v861_v1 = vpop.f32.mrb[10].mxu1 }
 0x1f6   : > { %v862_v2 = vpop.f32.mrb[11].mxu1 }
 0x1f7   : > { %v945_v3 = vpop.f32.mrb[12].mxu0 }
 0x1f8   : > { %v952_v4 = vadd.f32 %v945_v3, %v864_v62  ;;  %v947_v5 = vpop.f32.mrb[13].mxu0  ;;  %v1603_v3 = vsel %vm782_vm3, %v1602_v52, %v1601_v51  ;;  %vm2596_vm3 = vcmask 785408  }
 0x1f9   : > { %v953_v6 = vadd.f32 %v947_v5, %v865_v0  ;;  %v949_v7 = vpop.f32.mrb[14].mxu0 }
 0x1fa   : > { %v950_v8 = vpop.f32.mrb[15].mxu0 }
 0x1fb   : > { %v1026_v9 = vpop.f32.mrb[12].mxu1 }
 0x1fc   : > { %v1033_v10 = vadd.f32 %v1026_v9, %v952_v4  ;;  %v1028_v11 = vpop.f32.mrb[13].mxu1 }
 0x1fd   : > { %v1034_v12 = vadd.f32 %v1028_v11, %v953_v6  ;;  %v1030_v13 = vpop.f32.mrb[14].mxu1  ;;  %v1819_v6 = vpop.permute.xlu1 %1818 }
 0x1fe   : > { %v1031_v14 = vpop.f32.mrb[15].mxu1  ;;  %v1820_v8 = vrot.slane %v1819_v6, 4 }
 0x1ff   : > { %v1114_v15 = vpop.f32.mrb[16].mxu0 }
 0x200   : > { %v1121_v17 = vadd.f32 %v1114_v15, %v1033_v10  ;;  %v1116_v18 = vpop.f32.mrb[17].mxu0  ;;  %v1821_v14 = vsel %vm1039_vm7, %v1820_v8, %v1819_v6  ;;  %v1897_v15 = vld [vmem:[%s2267_s10] sm:$0x3f]  ;;  %vm2600_vm7 = vcmask 1041408  }
 0x201   : > { %v1122_v19 = vadd.f32 %v1116_v18, %v1034_v12  ;;  %v1118_v20 = vpop.f32.mrb[18].mxu0 }
 0x202   : > { %v1129_v21 = vadd.f32 %v1127_v16, %v1121_v17  ;;  %v1119_v23 = vpop.f32.mrb[19].mxu0 }
 0x203   : > { %v1130_v24 = vadd.f32 %v1127_v16, %v1122_v19  ;;  %v1906_v19 = vrot.slane %v1897_v15, %v2255_v22  ;;  %v1899_v23 = vcombine.high %v1897_v15, %v1897_v15 }
 0x204   : > { %v1131_v25 = vmax.f32 %v1129_v21, 0.0 }
 0x205   : > { %v1132_v26 = vmax.f32 %v1130_v24, 0.0  ;;  %v1914_v21 = vcombine.high %v1906_v19, %v1906_v19 }
 0x207   : > { %v2137_v29 = vpack.c.bf16 %v1132_v26, %v1131_v25  ;;  %v1913_v25 = vrot.slane %v1899_v23, %v2255_v22  ;;  %v1975_v26 = vld [vmem:[%s2587_s6] sm:$0xff] }
 0x208   : > { %v2080_v22 = vld [vmem:[%s2585_s4 + $0x4] sm:$0xf] }
 0x209   : > { %1143 = vrot.lane.b32.xlu0 %v2137_v29, %s2198_s18 }
 0x20d   : > { %1452 = vrot.lane.b32.xlu0 %v2260_v28, %s2187_s14  ;;  %s2136_s14 = sshll.u32 %s2604_s25, 4 }
 0x211   : > { %1678 = vrot.lane.b32.xlu0 %v2260_v28, %s2186_s13 }
 0x27b   : > { %v1144_v30 = vpop.permute.xlu0 %1143 }
 0x27c   : > { %v1145_v31 = vrot.slane %v1144_v30, 4 }
 0x27e   : > { %v1147_v32 = vsel %vm1146_vm0, %v1145_v31, %v1144_v30  ;;  %1155 = vst.msk [vmem:[#allocation2 + $0x8] sm:$0xf] %vm1154_vm14, %v1145_v31  ;;  %vm1222_vm0 = vcmask 64512  }
 0x27f   : > { %1153 = vst.msk [vmem:[#allocation2] sm:$0xff] %vm1152_vm12, %v1147_v32  ;;  %v1453_v36 = vpop.permute.xlu0 %1452 }
 0x280   : > { %v1454_v48 = vrot.slane %v1453_v36, 4 }
 0x282   : > { %v1455_v61 = vsel %vm613_vm5, %v1454_v48, %v1453_v36  ;;  %vm2598_vm5 = vcmask 769024  }
 0x285   : > { %v2429_v33 = vld [vmem:[#allocation2 + $0x8] sm:$0xf] }
 0x286   : > { %v1203_v34 = vld [vmem:[#allocation2 + $0x8] sm:$0xf]  ;;  %v2431_v35 = vld [vmem:[#allocation2] sm:$0xff]  ;;  %v2108_v37 = vcombine.low %v2429_v33, %v2429_v33  ;;  %v1459_v53 = vmul.bf16 %v1454_v48, %v2429_v33  ;;  %v1607_v58 = vmul.bf16 %v1602_v52, %v2429_v33  ;;  %v1825_v11 = vmul.bf16 %v1820_v8, %v2429_v33 }
 0x287   : > { %v2083_v38 = vcombine.low %v1203_v34, %v1203_v34  ;;  %v1201_v39 = vmul.bf16 %v2431_v35, %v2260_v28  ;;  %v2082_v44 = vcombine.high %v2431_v35, %v2431_v35  ;;  %v2081_v45 = vcombine.low %v2431_v35, %v2431_v35  ;;  %v1679_v28 = vpop.permute.xlu0 %1678  ;;  %v2093_v52 = vld [vmem:[%s2585_s4 + $0x8] sm:$0xf] }
 0x288   : > { %1544 = vrot.lane.b32.xlu1 %v2108_v37, %s2190_s17  ;;  %v1680_v49 = vrot.slane %v1679_v28, 4  ;;  %v1379_v50 = vmul.bf16 %v1374_v43, %v1203_v34  ;;  %v2102_v27 = vcombine.low %v1459_v53, %v1459_v53  ;;  %v1378_v60 = vmul.bf16 %v2431_v35, %v1375_v56 }
 0x289   : > { %1218 = vrot.lane.b32.xlu0 %v2083_v38, %s2189_s16  ;;  %v2087_v40 = vcombine.high %v1201_v39, %v1201_v39  ;;  %v2086_v41 = vcombine.low %v1201_v39, %v1201_v39  ;;  %v1458_v62 = vmul.bf16 %v1455_v61, %v2431_v35  ;;  %v2114_v63 = vcombine.low %v1607_v58, %v1607_v58  ;;  %v2099_v58 = vld [vmem:[%s2585_s4 + $0xc] sm:$0xf]  ;;  %v2105_v61 = vld [vmem:[%s2585_s4 + $0x10] sm:$0xf] }
 0x28a   : > { %v1685_v54 = vmul.bf16 %v1680_v49, %v2429_v33  ;;  %v2096_v55 = vcombine.low %v1379_v50, %v1379_v50  ;;  %v2094_v0 = vcombine.low %v1378_v60, %v1378_v60  ;;  %v2095_v1 = vcombine.high %v1378_v60, %v1378_v60 }
 0x28b   : > { %2088 = vmatprep.subr.msk.bf16.mxu0 %vm1226_vm13, %v2087_v40  ;;  %v1283_v47 = vsel %vm1226_vm13, %v2086_v41, 0  ;;  %v2101_v2 = vcombine.high %v1458_v62, %v1458_v62  ;;  %v1606_v4 = vmul.bf16 %v1603_v3, %v2431_v35  ;;  %v2100_v5 = vcombine.low %v1458_v62, %v1458_v62 }
 0x28c   : > { %1289 = vmatpush1.bf16.msra.mxu0 %v1283_v47  ;;  %1216 = vrot.lane.b32.xlu1 %v2082_v44, %s2189_s16  ;;  %v2120_v59 = vcombine.low %v1685_v54, %v1685_v54  ;;  %v1681_v7 = vsel %vm870_vm4, %v1680_v49, %v1679_v28  ;;  %v1824_v16 = vmul.bf16 %v1821_v14, %v2431_v35  ;;  %vm2597_vm4 = vmmov %vm2596_vm3  ;;  %v2123_v14 = vld [vmem:[%s2585_s4 + $0x1c] sm:$0xf] }
 0x28d   : > { %1214 = vrot.lane.b32.xlu0 %v2081_v45, %s2189_s16  ;;  %v1684_v9 = vmul.bf16 %v1681_v7, %v2431_v35  ;;  %v2113_v10 = vcombine.high %v1606_v4, %v1606_v4  ;;  %v2112_v12 = vcombine.low %v1606_v4, %v1606_v4  ;;  %v2129_v18 = vcombine.low %v1825_v11, %v1825_v11  ;;  %v2111_v4 = vld [vmem:[%s2585_s4 + $0x14] sm:$0xf]  ;;  %v2117_v11 = vld [vmem:[%s2585_s4 + $0x18] sm:$0xf] }
 0x28e   : > { %v2127_v20 = vcombine.low %v1824_v16, %v1824_v16  ;;  %v2128_v24 = vcombine.high %v1824_v16, %v1824_v16 }
 0x28f   : > { %2089 = vmatmul.mubr.msk.bf16.vlgmr.msra.gmra.mrb[20].mxu0 %vm1222_vm0, %v1202_v57  ;;  %v2118_v13 = vcombine.low %v1684_v9, %v1684_v9  ;;  %v2119_v17 = vcombine.high %v1684_v9, %v1684_v9 }
 0x290   : > { %1540 = vrot.lane.b32.xlu1 %v2081_v45, %s2190_s17  ;;  %1519 = vmatprep.mubr.bf16.mxu0 %v2191_v46 }
 0x291   : > { %1542 = vrot.lane.b32.xlu0 %v2082_v44, %s2190_s17 }
 0x294   : > { %1394 = vrot.lane.b32.xlu1 %v2096_v55, %s2192_s20 }
 0x295   : > { %1758 = vrot.lane.b32.xlu0 %v2081_v45, %s2196_s28 }
 0x298   : > { %1700 = vrot.lane.b32.xlu1 %v2120_v59, %s2193_s21 }
 0x299   : > { %1474 = vrot.lane.b32.xlu0 %v2102_v27, %s2194_s22 }
 0x29c   : > { %1390 = vrot.lane.b32.xlu1 %v2094_v0, %s2192_s20 }
 0x29d   : > { %1622 = vrot.lane.b32.xlu0 %v2114_v63, %s2195_s27 }
 0x2a0   : > { %1472 = vrot.lane.b32.xlu1 %v2101_v2, %s2194_s22 }
 0x2a1   : > { %1392 = vrot.lane.b32.xlu0 %v2095_v1, %s2192_s20  ;;  %s278_s20 = scalar_lea.vmem %s2588_s7, %s2136_s14 }
 0x2a4   : > { %1760 = vrot.lane.b32.xlu1 %v2082_v44, %s2196_s28 }
 0x2a5   : > { %1470 = vrot.lane.b32.xlu0 %v2100_v5, %s2194_s22 }
 0x2a8   : > { %1620 = vrot.lane.b32.xlu1 %v2113_v10, %s2195_s27 }
 0x2a9   : > { %1762 = vrot.lane.b32.xlu0 %v2108_v37, %s2196_s28 }
 0x2ac   : > { %1696 = vrot.lane.b32.xlu1 %v2118_v13, %s2193_s21 }
 0x2ad   : > { %1618 = vrot.lane.b32.xlu0 %v2112_v12, %s2195_s27 }
 0x2b0   : > { %1840 = vrot.lane.b32.xlu1 %v2129_v18, %s2197_s29 }
 0x2b1   : > { %1698 = vrot.lane.b32.xlu0 %v2119_v17, %s2193_s21 }
 0x2b4   : > { %1836 = vrot.lane.b32.xlu1 %v2127_v20, %s2197_s29 }
 0x2b5   : > { %1915 = vrot.lane.b32.xlu0 %v1906_v19, %s2190_s17 }
 0x2b8   : > { %1917 = vrot.lane.b32.xlu1 %v1914_v21, %s2190_s17  ;;  %v2126_v21 = vld [vmem:[%s2585_s4 + $0x20] sm:$0xf] }
 0x2b9   : > { %1838 = vrot.lane.b32.xlu0 %v2128_v24, %s2197_s29 }
 0x2bc   : > { %1978 = vperm.xlu1 %2164, %v1975_v26   ;;  %v1896_v26 = vld [vmem:[%s2586_s5] sm:$0xf] }
 0x2bd   : > { %1919 = vrot.lane.b32.xlu0 %v1913_v25, %s2190_s17 }
 0x2fa   : > { %v1545_v29 = vpop.permute.xlu1 %1544 }
 0x2fb   : > { %v1219_v30 = vpop.permute.xlu0 %1218 }
 0x2fe   : > { %v1217_v31 = vpop.permute.xlu1 %1216 }
 0x2ff   : > { %v1215_v32 = vpop.permute.xlu0 %1214  ;;  %v1221_v33 = vsel %vm358_vm6, %v1217_v31, %v1219_v30 }
 0x300   : > { %v1220_v34 = vsel %vm358_vm6, %v1215_v32, %v1217_v31  ;;  %2084 = vmatprep.subr.msk.bf16.mxu1 %vm1226_vm13, %v1221_v33  ;;  %vm2599_vm6 = vmmov %vm2598_vm5 }
 0x301   : > { %v1228_v35 = vsel %vm1226_vm13, %v1220_v34, 0 }
 0x302   : > { %1234 = vmatpush1.bf16.msra.mxu1 %v1228_v35  ;;  %v1541_v36 = vpop.permute.xlu1 %1540 }
 0x303   : > { %v1543_v37 = vpop.permute.xlu0 %1542 }
 0x304   : > { %v1546_v50 = vsel %vm723_vm9, %v1541_v36, %v1543_v37  ;;  %v1547_v51 = vsel %vm723_vm9, %v1543_v37, %v1545_v29 }
 0x305   : > { %2085 = vmatmul.mubr.msk.bf16.vlgmr.msra.gmra.mrb[16].mxu1 %vm1222_vm0, %v2080_v22  ;;  %v1552_v56 = vsel %vm1226_vm13, %v1546_v50, 0 }
 0x306   : > { %1439 = vmatprep.mubr.bf16.mxu1 %v2191_v46  ;;  %v1395_v38 = vpop.permute.xlu1 %1394 }
 0x307   : > { %v1759_v39 = vpop.permute.xlu0 %1758 }
 0x30a   : > { %v1701_v40 = vpop.permute.xlu1 %1700 }
 0x30b   : > { %v1475_v41 = vpop.permute.xlu0 %1474 }
 0x30e   : > { %v1391_v42 = vpop.permute.xlu1 %1390 }
 0x30f   : > { %v1623_v43 = vpop.permute.xlu0 %1622 }
 0x312   : > { %v1473_v44 = vpop.permute.xlu1 %1472 }
 0x313   : > { %v1393_v45 = vpop.permute.xlu0 %1392  ;;  %v1477_v47 = vsel %vm642_vm10, %v1473_v44, %v1475_v41 }
 0x314   : > { %v1396_v28 = vsel %vm554_vm8, %v1391_v42, %v1393_v45  ;;  %v1397_v48 = vsel %vm554_vm8, %v1393_v45, %v1395_v38  ;;  %2103 = vmatprep.subr.msk.bf16.mxu0 %vm1226_vm13, %v1477_v47  ;;  %vm2601_vm8 = vmmov %vm2600_vm7 }
 0x315   : > { %v1402_v49 = vsel %vm1226_vm13, %v1396_v28, 0  ;;  %2097 = vmatprep.subr.msk.bf16.mxu1 %vm1226_vm13, %v1397_v48 }
 0x316   : > { %1408 = vmatpush1.bf16.msra.mxu1 %v1402_v49  ;;  %v1761_v53 = vpop.permute.xlu1 %1760 }
 0x317   : > { %2109 = vmatprep.subr.msk.bf16.mxu1 %vm1226_vm13, %v1547_v51  ;;  %v1471_v54 = vpop.permute.xlu0 %1470  ;;  %v1764_v2 = vsel %vm2594_vm1, %v1759_v39, %v1761_v53 }
 0x318   : > { %v1476_v55 = vsel %vm642_vm10, %v1471_v54, %v1473_v44  ;;  %v1770_v9 = vsel %vm1226_vm13, %v1764_v2, 0  ;;  %vm2602_vm10 = vcmask 31744  }
 0x319   : > { %v1482_v57 = vsel %vm1226_vm13, %v1476_v55, 0  ;;  %2098 = vmatmul.mubr.msk.bf16.vlgmr.msra.gmra.mrb[20].mxu1 %vm1222_vm0, %v2093_v52 }
 0x31a   : > { %1488 = vmatpush1.bf16.msra.mxu0 %v1482_v57  ;;  %1558 = vmatpush1.bf16.msra.mxu1 %v1552_v56  ;;  %v1621_v27 = vpop.permute.xlu1 %1620 }
 0x31b   : > { %v1763_v59 = vpop.permute.xlu0 %1762  ;;  %1589 = vmatprep.mubr.bf16.mxu1 %v2191_v46  ;;  %v1625_v60 = vsel %vm811_vm11, %v1621_v27, %v1623_v43 }
 0x31c   : > { %2115 = vmatprep.subr.msk.bf16.mxu0 %vm1226_vm13, %v1625_v60  ;;  %v1765_v3 = vsel %vm2595_vm2, %v1761_v53, %v1763_v59 }
 0x31d   : > { %2104 = vmatmul.mubr.msk.bf16.vlgmr.msra.gmra.mrb[24].mxu0 %vm1222_vm0, %v2099_v58 }
 0x31e   : > { %1667 = vmatprep.mubr.bf16.mxu0 %v2191_v46  ;;  %v1697_v62 = vpop.permute.xlu1 %1696 }
 0x31f   : > { %v1619_v63 = vpop.permute.xlu0 %1618 }
 0x320   : > { %v1624_v0 = vsel %vm811_vm11, %v1619_v63, %v1621_v27 }
 0x321   : > { %v1630_v1 = vsel %vm1226_vm13, %v1624_v0, 0  ;;  %2110 = vmatmul.mubr.msk.bf16.vlgmr.msra.gmra.mrb[24].mxu1 %vm1222_vm0, %v2105_v61 }
 0x322   : > { %1636 = vmatpush1.bf16.msra.mxu0 %v1630_v1  ;;  %1745 = vmatprep.mubr.bf16.mxu1 %v2191_v46  ;;  %v1841_v5 = vpop.permute.xlu1 %1840 }
 0x323   : > { %2124 = vmatprep.subr.msk.bf16.mxu0 %vm1226_vm13, %v1765_v3  ;;  %v1699_v6 = vpop.permute.xlu0 %1698 }
 0x324   : > { %v1702_v7 = vsel %vm2596_vm3, %v1697_v62, %v1699_v6  ;;  %v1703_v8 = vsel %vm2597_vm4, %v1699_v6, %v1701_v40 }
 0x325   : > { %v1708_v10 = vsel %vm1226_vm13, %v1702_v7, 0  ;;  %2116 = vmatmul.mubr.msk.bf16.vlgmr.msra.gmra.mrb[28].mxu0 %vm1222_vm0, %v2111_v4  ;;  %2121 = vmatprep.subr.msk.bf16.mxu1 %vm1226_vm13, %v1703_v8 }
 0x326   : > { %1714 = vmatpush1.bf16.msra.mxu1 %v1708_v10  ;;  %1776 = vmatpush1.bf16.msra.mxu0 %v1770_v9  ;;  %v1837_v12 = vpop.permute.xlu1 %1836 }
 0x327   : > { %v1916_v13 = vpop.permute.xlu0 %1915  ;;  %1807 = vmatprep.mubr.bf16.mxu0 %v2191_v46 }
 0x329   : > { %2122 = vmatmul.mubr.msk.bf16.vlgmr.msra.gmra.mrb[28].mxu1 %vm1222_vm0, %v2117_v11 }
 0x32a   : > { %1885 = vmatprep.mubr.bf16.mxu1 %v2191_v46  ;;  %v1918_v15 = vpop.permute.xlu1 %1917 }
 0x32b   : > { %v1839_v16 = vpop.permute.xlu0 %1838  ;;  %v1921_v20 = vsel %vm723_vm9, %v1916_v13, %v1918_v15 }
 0x32c   : > { %v1842_v17 = vsel %vm2598_vm5, %v1837_v12, %v1839_v16  ;;  %v1843_v18 = vsel %vm2599_vm6, %v1839_v16, %v1841_v5  ;;  %v1927_v25 = vsel %vm2600_vm7, %v1921_v20, 0 }
 0x32d   : > { %v1848_v19 = vsel %vm1226_vm13, %v1842_v17, 0  ;;  %2125 = vmatmul.mubr.msk.bf16.vlgmr.msra.gmra.mrb[32].mxu0 %vm1222_vm0, %v2123_v14  ;;  %2130 = vmatprep.subr.msk.bf16.mxu1 %vm1226_vm13, %v1843_v18 }
 0x32e   : > { %1854 = vmatpush1.bf16.msra.mxu1 %v1848_v19  ;;  %1964 = vmatprep.mubr.bf16.mxu0 %v2191_v46 }
 0x32f   : > { %v1920_v23 = vpop.permute.xlu0 %1919 }
 0x330   : > { %v1922_v24 = vsel %vm723_vm9, %v1918_v15, %v1920_v23 }
 0x331   : > { %2131 = vmatmul.mubr.msk.bf16.vlgmr.msra.gmra.mrb[32].mxu1 %vm1222_vm0, %v2126_v21  ;;  %2132 = vmatprep.subr.msk.bf16.mxu0 %vm2601_vm8, %v1922_v24 }
 0x332   : > { %1933 = vmatpush1.bf16.msra.mxu0 %v1927_v25 }
 0x335   : > { %2133 = vmatmul.mubr.msk.bf16.vlgmr.msra.gmra.mrb[36].mxu0 %vm2602_vm10, %v1896_v26 }
 0x33b   : > { %v1979_v17 = vpop.permute.xlu1 %1978 }
 0x362   : > { %v1322_v29 = vpop.f32.mrb[20].mxu0 }
 0x363   : > { %v1324_v30 = vpop.f32.mrb[21].mxu0 }
 0x364   : > { %v1326_v31 = vpop.f32.mrb[22].mxu0 }
 0x365   : > { %v1327_v46 = vpop.f32.mrb[23].mxu0 }
 0x3d8   : > { %v1267_v32 = vpop.f32.mrb[16].mxu1 }
 0x3d9   : > { %v1269_v33 = vpop.f32.mrb[17].mxu1  ;;  %v1323_v34 = vadd.f32 %v1322_v29, %v1267_v32 }
 0x3da   : > { %v1271_v35 = vpop.f32.mrb[18].mxu1  ;;  %v1325_v22 = vadd.f32 %v1324_v30, %v1269_v33 }
 0x3db   : > { %v1272_v36 = vpop.f32.mrb[19].mxu1 }
 0x3ec   : > { %v1441_v37 = vpop.f32.mrb[20].mxu1 }
 0x3ed   : > { %v1448_v38 = vadd.f32 %v1441_v37, %v1323_v34  ;;  %v1443_v39 = vpop.f32.mrb[21].mxu1 }
 0x3ee   : > { %v1449_v40 = vadd.f32 %v1443_v39, %v1325_v22  ;;  %v1445_v41 = vpop.f32.mrb[22].mxu1 }
 0x3ef   : > { %v1446_v42 = vpop.f32.mrb[23].mxu1 }
 0x3f0   : > { %v1521_v43 = vpop.f32.mrb[24].mxu0 }
 0x3f1   : > { %v1528_v44 = vadd.f32 %v1521_v43, %v1448_v38  ;;  %v1523_v45 = vpop.f32.mrb[25].mxu0 }
 0x3f2   : > { %v1529_v47 = vadd.f32 %v1523_v45, %v1449_v40  ;;  %v1525_v28 = vpop.f32.mrb[26].mxu0 }
 0x3f3   : > { %v1526_v48 = vpop.f32.mrb[27].mxu0 }
 0x3f4   : > { %v1591_v49 = vpop.f32.mrb[24].mxu1 }
 0x3f5   : > { %v1598_v50 = vadd.f32 %v1591_v49, %v1528_v44  ;;  %v1593_v51 = vpop.f32.mrb[25].mxu1 }
 0x3f6   : > { %v1599_v52 = vadd.f32 %v1593_v51, %v1529_v47  ;;  %v1595_v53 = vpop.f32.mrb[26].mxu1 }
 0x3f7   : > { %v1596_v54 = vpop.f32.mrb[27].mxu1 }
 0x3f8   : > { %v1669_v55 = vpop.f32.mrb[28].mxu0 }
 0x3f9   : > { %v1676_v56 = vadd.f32 %v1669_v55, %v1598_v50  ;;  %v1671_v57 = vpop.f32.mrb[29].mxu0 }
 0x3fa   : > { %v1677_v58 = vadd.f32 %v1671_v57, %v1599_v52  ;;  %v1673_v27 = vpop.f32.mrb[30].mxu0 }
 0x3fb   : > { %v1674_v59 = vpop.f32.mrb[31].mxu0 }
 0x3fc   : > { %v1747_v60 = vpop.f32.mrb[28].mxu1 }
 0x3fd   : > { %v1754_v61 = vadd.f32 %v1747_v60, %v1676_v56  ;;  %v1749_v62 = vpop.f32.mrb[29].mxu1 }
 0x3fe   : > { %v1755_v63 = vadd.f32 %v1749_v62, %v1677_v58  ;;  %v1751_v0 = vpop.f32.mrb[30].mxu1 }
 0x3ff   : > { %v1752_v1 = vpop.f32.mrb[31].mxu1 }
 0x400   : > { %v1809_v2 = vpop.f32.mrb[32].mxu0 }
 0x401   : > { %v1816_v3 = vadd.f32 %v1809_v2, %v1754_v61  ;;  %v1811_v4 = vpop.f32.mrb[33].mxu0 }
 0x402   : > { %v1817_v5 = vadd.f32 %v1811_v4, %v1755_v63  ;;  %v1813_v6 = vpop.f32.mrb[34].mxu0 }
 0x403   : > { %v1814_v7 = vpop.f32.mrb[35].mxu0 }
 0x404   : > { %v1887_v8 = vpop.f32.mrb[32].mxu1 }
 0x405   : > { %v1894_v9 = vadd.f32 %v1887_v8, %v1816_v3  ;;  %v1889_v10 = vpop.f32.mrb[33].mxu1 }
 0x406   : > { %v1895_v11 = vadd.f32 %v1889_v10, %v1817_v5  ;;  %v1891_v12 = vpop.f32.mrb[34].mxu1 }
 0x407   : > { %v1892_v13 = vpop.f32.mrb[35].mxu1 }
 0x408   : > { %v1966_v14 = vpop.f32.mrb[36].mxu0 }
 0x409   : > { %v1973_v15 = vadd.f32 %v1966_v14, %v1894_v9  ;;  %v1968_v16 = vpop.f32.mrb[37].mxu0 }
 0x40a   : > { %v1974_v18 = vadd.f32 %v1968_v16, %v1895_v11  ;;  %v1970_v19 = vpop.f32.mrb[38].mxu0 }
 0x40b   : > { %v1981_v20 = vadd.f32 %v1979_v17, %v1973_v15  ;;  %v1971_v21 = vpop.f32.mrb[39].mxu0 }
 0x40c   : > { %v1982_v23 = vadd.f32 %v1979_v17, %v1974_v18 }
 0x40d   : > { %1983 = vst [vmem:[%s278_s20] sm:$0xff] %v1981_v20 }
 0x40e   : > { %1984 = vst [vmem:[%s278_s20 + $0x8] sm:$0xff] %v1982_v23 }
 0x40f PF: > { %s17_s24 = sadd.s32 1, %s2180_s24  }
 0x410   : > { %p14_p4 = scmp.ge.s32.totalorder %s17_s24, 4  }
 0x412   :  { %16 = sbr.rel (!%p14_p4) target bundleno = 1 (0x1), region = 95 }

</bundles_post_ra>
